<compile_context>
chip_gen: v7x
topology: tpu7x:2x2x1
jax: 0.10.0
libtpu: 0.0.40
codegen_flags: <defaults>
</compile_context>

<pallas_src>
import functools

import jax
import jax.numpy as jnp
from jax.experimental import pallas as pl
from jax.experimental.pallas import tpu as pltpu

# Explicit scoped-VMEM budget: safe on v5e/v6e (128 MiB physical) and v7x
# (64 MiB physical, 32 MiB default scoped).
VMEM_LIMIT = 32 * 1024 * 1024


def _round_up(x, m):
    return (x + m - 1) // m * m


def _pick_tile(dim, cands):
    """Largest candidate (all multiples of 128) dividing the 128-padded dim."""
    dp = _round_up(dim, 128)
    for c in cands:
        if c <= dp and dp % c == 0:
            return c
    return 128


def _apply_act(y, act):
    if act == "none":
        return y
    if act == "relu":
        return jnp.maximum(y, 0.0)
    if act == "hardswish":
        return y * jnp.clip(y + 3.0, 0.0, 6.0) * (1.0 / 6.0)
    if act == "hardsigmoid":
        return jnp.clip(y + 3.0, 0.0, 6.0) * (1.0 / 6.0)
    raise ValueError(act)


# ---------------------------------------------------------------------------
# Pallas kernels
# ---------------------------------------------------------------------------

def _matmul_kernel(*refs, act, k_steps, has_res):
    """bf16 x/w tiles -> f32 accumulation in the resident output block,
    fused bias + activation (+ optional residual) epilogue."""
    if has_res:
        x_ref, w_ref, b_ref, r_ref, o_ref = refs
    else:
        x_ref, w_ref, b_ref, o_ref = refs
        r_ref = None
    kk = pl.program_id(2)

    @pl.when(kk == 0)
    def _():
        o_ref[...] = jnp.zeros_like(o_ref)

    o_ref[...] += jnp.dot(x_ref[...], w_ref[...],
                          preferred_element_type=jnp.float32)

    @pl.when(kk == k_steps - 1)
    def _():
        y = _apply_act(o_ref[...] + b_ref[...], act)
        if has_res:
            y = y + r_ref[...]
        o_ref[...] = y


def matmul_bias_act(x, w, b, act="none", residual=None,
                    tm_max=512, tn_max=256, tk_max=512):
    """x:[M,K] @ w:[K,N] + b[N] (+ residual[M,N]) with fused activation."""
    M, K = x.shape
    K2, N = w.shape
    assert K == K2
    tn = _pick_tile(N, tuple(c for c in (512, 256, 128) if c <= tn_max))
    tk = _pick_tile(K, tuple(c for c in (512, 256, 128) if c <= tk_max))
    Np, Kp = _round_up(N, tn), _round_up(K, tk)

    tm = min(tm_max, _round_up(M, 8))
    Mp = _round_up(M, tm)
    # Give the second TensorCore (v7x megacore) work when both parallel axes
    # would otherwise collapse to a single block.
    if Mp // tm == 1 and Np // tn == 1 and M >= 16:
        tm = _round_up(M, 16) // 2
        Mp = _round_up(M, tm)
    k_steps = Kp // tk

    xp = jnp.pad(x.astype(jnp.bfloat16), ((0, Mp - M), (0, Kp - K)))
    wp = jnp.pad(w.astype(jnp.bfloat16), ((0, Kp - K), (0, Np - N)))
    bp = jnp.pad(b.astype(jnp.float32), ((0, Np - N),)).reshape(1, Np)

    in_specs = [
        pl.BlockSpec((tm, tk), lambda i, j, k: (i, k)),
        pl.BlockSpec((tk, tn), lambda i, j, k: (k, j)),
        pl.BlockSpec((1, tn), lambda i, j, k: (0, j)),
    ]
    args = [xp, wp, bp]
    has_res = residual is not None
    if has_res:
        rp = jnp.pad(residual.astype(jnp.float32), ((0, Mp - M), (0, Np - N)))
        in_specs.append(pl.BlockSpec((tm, tn), lambda i, j, k: (i, j)))
        args.append(rp)

    out = pl.pallas_call(
        functools.partial(_matmul_kernel, act=act, k_steps=k_steps,
                          has_res=has_res),
        out_shape=jax.ShapeDtypeStruct((Mp, Np), jnp.float32),
        grid_spec=pltpu.PrefetchScalarGridSpec(
            num_scalar_prefetch=0,
            grid=(Mp // tm, Np // tn, k_steps),
            in_specs=in_specs,
            out_specs=pl.BlockSpec((tm, tn), lambda i, j, k: (i, j)),
        ),
        compiler_params=pltpu.CompilerParams(
            dimension_semantics=("parallel", "parallel", "arbitrary"),
            vmem_limit_bytes=VMEM_LIMIT),
    )(*args)
    return out[:M, :N]


def _dw_kernel(x_ref, w_ref, b_ref, o_ref, *, taps, act):
    """Depthwise conv: the (padded / space-to-depth'd) image lives in VMEM;
    every tap is a static pl.ds window read, accumulated in f32."""
    _, ho, wo, c = o_ref.shape
    acc = jnp.zeros((ho, wo, c), jnp.float32)
    for t, (r0, c0) in enumerate(taps):
        xt = x_ref[0, pl.ds(r0, ho), pl.ds(c0, wo), :]
        acc = acc + xt.astype(jnp.float32) * w_ref[t].astype(jnp.float32)
    o_ref[0] = _apply_act(acc + b_ref[0], act).astype(o_ref.dtype)


def depthwise_conv_bn_act(x, w, b, *, stride=1, padding=0, dilation=1,
                          act="none"):
    """x:[N,H,W,C], w:[KH,KW,C] (one filter per channel).  The input is read
    from HBM exactly once; taps are generated in VMEM (no [T,M,C] stack)."""
    n, h, wd, c = x.shape
    kh, kw, _ = w.shape
    ho = (h + 2 * padding - dilation * (kh - 1) - 1) // stride + 1
    wo = (wd + 2 * padding - dilation * (kw - 1) - 1) // stride + 1

    xb = x.astype(jnp.bfloat16)
    if stride == 1:
        xdw = jnp.pad(xb, ((0, 0), (padding, padding),
                           (padding, padding), (0, 0)))
        taps = [(i * dilation, j * dilation)
                for i in range(kh) for j in range(kw)]
    elif stride == 2:
        # Space-to-depth (done once by XLA) so the kernel only needs
        # stride-1 windows: parity slab p = 2*(row%2) + (col%2) is folded
        # into the row axis -> row index p*hp2 + row//2.
        hp = h + 2 * padding
        wp = wd + 2 * padding
        hp += hp % 2
        wp += wp % 2
        xp = jnp.pad(xb, ((0, 0), (padding, hp - h - padding),
                          (padding, wp - wd - padding), (0, 0)))
        hp2, wp2 = hp // 2, wp // 2
        xdw = xp.reshape(n, hp2, 2, wp2, 2, c)
        xdw = xdw.transpose(0, 2, 4, 1, 3, 5).reshape(n, 4 * hp2, wp2, c)
        taps = []
        for i in range(kh):
            for j in range(kw):
                ro, co = i * dilation, j * dilation
                p = (ro % 2) * 2 + (co % 2)
                taps.append((p * hp2 + ro // 2, co // 2))
    else:
        raise NotImplementedError("depthwise stride > 2 not used by this net")

    wf = w.reshape(kh * kw, c).astype(jnp.float32)
    bf = b.reshape(1, c).astype(jnp.float32)

    # TODO(synk): at large resolutions, switch to row-blocked grids with
    # manual halo DMA (pl.ANY + make_async_copy) instead of whole-image blocks.
    out = pl.pallas_call(
        functools.partial(_dw_kernel, taps=taps, act=act),
        out_shape=jax.ShapeDtypeStruct((n, ho, wo, c), jnp.float32),
        grid_spec=pltpu.PrefetchScalarGridSpec(
            num_scalar_prefetch=0,
            grid=(n,),
            in_specs=[
                pl.BlockSpec((1, xdw.shape[1], xdw.shape[2], c),
                             lambda bb: (bb, 0, 0, 0)),
                pl.BlockSpec((kh * kw, c), lambda bb: (0, 0)),
                pl.BlockSpec((1, c), lambda bb: (0, 0)),
            ],
            out_specs=pl.BlockSpec((1, ho, wo, c), lambda bb: (bb, 0, 0, 0)),
        ),
        compiler_params=pltpu.CompilerParams(
            dimension_semantics=("parallel",),
            vmem_limit_bytes=VMEM_LIMIT),
    )(xdw, wf, bf)
    return out


def _gap_kernel(x_ref, o_ref, *, inv_hw):
    @pl.when(pl.program_id(1) == 0)
    def _():
        o_ref[...] = jnp.zeros_like(o_ref)

    o_ref[...] += jnp.sum(x_ref[...], axis=1, keepdims=True)

    @pl.when(pl.program_id(1) == pl.num_programs(1) - 1)
    def _():
        o_ref[...] *= inv_hw


def global_avg_pool(x):
    """x:[N,HW,C] -> [N,1,C] (gridded spatial reduction)."""
    n, hw, c = x.shape
    thw = min(512, _round_up(hw, 8))
    hwp = _round_up(hw, thw)
    xp = jnp.pad(x.astype(jnp.float32), ((0, 0), (0, hwp - hw), (0, 0)))
    steps = hwp // thw
    return pl.pallas_call(
        functools.partial(_gap_kernel, inv_hw=1.0 / hw),
        out_shape=jax.ShapeDtypeStruct((n, 1, c), jnp.float32),
        grid_spec=pltpu.PrefetchScalarGridSpec(
            num_scalar_prefetch=0,
            grid=(n, steps),
            in_specs=[pl.BlockSpec((1, thw, c), lambda bb, s: (bb, s, 0))],
            out_specs=pl.BlockSpec((1, 1, c), lambda bb, s: (bb, 0, 0)),
        ),
        compiler_params=pltpu.CompilerParams(
            dimension_semantics=("parallel", "arbitrary"),
            vmem_limit_bytes=VMEM_LIMIT),
    )(xp)


def _scale_kernel(x_ref, s_ref, o_ref):
    o_ref[...] = x_ref[...] * s_ref[...]


def se_scale(x, s):
    """x:[N,HW,C] * s:[N,1,C] broadcast over spatial (SE excitation)."""
    n, hw, c = x.shape
    thw = min(512, _round_up(hw, 8))
    hwp = _round_up(hw, thw)
    xp = jnp.pad(x.astype(jnp.float32), ((0, 0), (0, hwp - hw), (0, 0)))
    out = pl.pallas_call(
        _scale_kernel,
        out_shape=jax.ShapeDtypeStruct((n, hwp, c), jnp.float32),
        grid_spec=pltpu.PrefetchScalarGridSpec(
            num_scalar_prefetch=0,
            grid=(n, hwp // thw),
            in_specs=[
                pl.BlockSpec((1, thw, c), lambda bb, s_: (bb, s_, 0)),
                pl.BlockSpec((1, 1, c), lambda bb, s_: (bb, 0, 0)),
            ],
            out_specs=pl.BlockSpec((1, thw, c), lambda bb, s_: (bb, s_, 0)),
        ),
        compiler_params=pltpu.CompilerParams(
            dimension_semantics=("parallel", "parallel"),
            vmem_limit_bytes=VMEM_LIMIT),
    )(xp, s.astype(jnp.float32))
    return out[:, :hw]


# ---------------------------------------------------------------------------
# Conv wrappers (tap liveness / minimal padding is static glue; compute runs
# in the Pallas matmul / depthwise kernels)
# ---------------------------------------------------------------------------

def conv2d_bn_act(x, w, b, *, stride=1, padding=0, dilation=1, act="none",
                  residual=None):
    """x:[N,H,W,Cin] NHWC, w:[KH,KW,Cin,Cout] (BN folded into w,b).
    Dead taps (receptive offsets that fall entirely into zero-padding for
    every output position) are eliminated statically, so the ASPP dilated
    3x3 branches reduce to 1x1 convs with no pad-by-rate blow-up."""
    n, h, wd, cin = x.shape
    kh, kw, _, cout = w.shape
    ho = (h + 2 * padding - dilation * (kh - 1) - 1) // stride + 1
    wo = (wd + 2 * padding - dilation * (kw - 1) - 1) // stride + 1

    def live_taps(kdim, osz, isz):
        live = []
        for t in range(kdim):
            lo = t * dilation - padding
            hi = (osz - 1) * stride + t * dilation - padding
            live.append(not (hi < 0 or lo > isz - 1))
        return live

    lr = live_taps(kh, ho, h)
    lc = live_taps(kw, wo, wd)
    taps = [(i, j) for i in range(kh) for j in range(kw) if lr[i] and lc[j]]
    assert taps, "conv with no live taps"

    min_r = min(i * dilation for i, _ in taps)
    max_r = max(i * dilation for i, _ in taps)
    min_c = min(j * dilation for _, j in taps)
    max_c = max(j * dilation for _, j in taps)
    pad_r0 = max(0, padding - min_r)
    pad_r1 = max(0, (ho - 1) * stride + max_r - padding - (h - 1))
    pad_c0 = max(0, padding - min_c)
    pad_c1 = max(0, (wo - 1) * stride + max_c - padding - (wd - 1))

    xb = x.astype(jnp.bfloat16)
    res2d = (residual.reshape(n * ho * wo, cout)
             if residual is not None else None)

    if (len(taps) == 1 and stride == 1 and ho == h and wo == wd
            and taps[0][0] * dilation - padding == 0
            and taps[0][1] * dilation - padding == 0):
        # conv degenerates to a 1x1 conv with the surviving tap's weights
        i0, j0 = taps[0]
        out = matmul_bias_act(xb.reshape(n * h * wd, cin), w[i0, j0], b,
                              act=act, residual=res2d)
        return out.reshape(n, ho, wo, cout)

    # TODO(synk): for the remaining kxk convs (3-ch stem, 4x4 head 3x3) the
    # im2col copy is negligible; a direct-window tap-grid matmul would remove
    # it entirely at larger resolutions.
    xp = jnp.pad(xb, ((0, 0), (pad_r0, pad_r1), (pad_c0, pad_c1), (0, 0)))
    cols = []
    for (i, j) in taps:
        r_start = i * dilation - padding + pad_r0
        c_start = j * dilation - padding + pad_c0
        sl = jax.lax.slice(
            xp,
            (0, r_start, c_start, 0),
            (n, r_start + (ho - 1) * stride + 1,
             c_start + (wo - 1) * stride + 1, cin),
            (1, stride, stride, 1))
        cols.append(sl)
    patches = jnp.concatenate(cols, axis=-1).reshape(n * ho * wo,
                                                     len(taps) * cin)
    w_live = jnp.stack([w[i, j] for (i, j) in taps],
                       axis=0).reshape(len(taps) * cin, cout)
    out = matmul_bias_act(patches, w_live, b, act=act, residual=res2d)
    return out.reshape(n, ho, wo, cout)


# ---------------------------------------------------------------------------
# Deterministic synthetic parameters (Conv+BN folded; eval-mode semantics)
# ---------------------------------------------------------------------------

class ParamGen:
    def __init__(self, key):
        self._key = key

    def take(self):
        self._key, k = jax.random.split(self._key)
        return k

    def conv(self, kh, kw, cin, cout):
        fan_in = kh * kw * cin
        w = jax.random.normal(self.take(), (kh, kw, cin, cout), jnp.float32)
        w = w * (2.0 / fan_in) ** 0.5
        b = 0.01 * jax.random.normal(self.take(), (cout,), jnp.float32)
        return w, b

    def dwconv(self, kh, kw, c):
        w = jax.random.normal(self.take(), (kh, kw, c), jnp.float32)
        w = w * (2.0 / (kh * kw)) ** 0.5
        b = 0.01 * jax.random.normal(self.take(), (c,), jnp.float32)
        return w, b


def conv_bn_act_layer(pg, x, cout, kernel, *, stride=1, dilation=1,
                      act="relu", residual=None):
    cin = x.shape[-1]
    padding = (kernel - 1) // 2 * dilation
    w, b = pg.conv(kernel, kernel, cin, cout)
    return conv2d_bn_act(x, w, b, stride=stride, padding=padding,
                         dilation=dilation, act=act, residual=residual)


def dw_bn_act_layer(pg, x, kernel, *, stride=1, dilation=1, act="relu"):
    c = x.shape[-1]
    padding = (kernel - 1) // 2 * dilation
    w, b = pg.dwconv(kernel, kernel, c)
    return depthwise_conv_bn_act(x, w, b, stride=stride, padding=padding,
                                 dilation=dilation, act=act)


def _make_divisible(v, divisor=8):
    new_v = max(divisor, int(v + divisor / 2) // divisor * divisor)
    if new_v < 0.9 * v:
        new_v += divisor
    return new_v


def squeeze_excitation(pg, x):
    n, h, w, c = x.shape
    sq = _make_divisible(c // 4, 8)
    x2 = x.reshape(n, h * w, c)
    s = global_avg_pool(x2)                                       # [N,1,C]
    w1, b1 = pg.conv(1, 1, c, sq)
    s = matmul_bias_act(s.reshape(n, c), w1.reshape(c, sq), b1, act="relu")
    w2, b2 = pg.conv(1, 1, sq, c)
    s = matmul_bias_act(s, w2.reshape(sq, c), b2, act="hardsigmoid")
    out = se_scale(x2, s.reshape(n, 1, c))
    return out.reshape(n, h, w, c)


def inverted_residual(pg, x, *, kernel, expanded, cout, use_se, act, stride,
                      dilation):
    cin = x.shape[-1]
    use_res = (stride == 1 and cin == cout)          # torchvision: config stride
    eff_stride = 1 if dilation > 1 else stride       # dilation replaces stride
    h = x
    if expanded != cin:
        h = conv_bn_act_layer(pg, h, expanded, 1, act=act)
    h = dw_bn_act_layer(pg, h, kernel, stride=eff_stride, dilation=dilation,
                        act=act)
    if use_se:
        h = squeeze_excitation(pg, h)
    # linear projection; residual add fused into the matmul epilogue
    h = conv_bn_act_layer(pg, h, cout, 1, act="none",
                          residual=(x if use_res else None))
    return h


# (kernel, expanded, out, use_se, activation, stride, dilation) — torchvision
# mobilenet_v3_large config with dilated last stage (deeplab backbone, OS=16).
_MOBILENET_V3_LARGE_DILATED = [
    (3,  16,  16, False, "relu",      1, 1),
    (3,  64,  24, False, "relu",      2, 1),
    (3,  72,  24, False, "relu",      1, 1),
    (5,  72,  40, True,  "relu",      2, 1),
    (5, 120,  40, True,  "relu",      1, 1),
    (5, 120,  40, True,  "relu",      1, 1),
    (3, 240,  80, False, "hardswish", 2, 1),
    (3, 200,  80, False, "hardswish", 1, 1),
    (3, 184,  80, False, "hardswish", 1, 1),
    (3, 184,  80, False, "hardswish", 1, 1),
    (3, 480, 112, True,  "hardswish", 1, 1),
    (3, 672, 112, True,  "hardswish", 1, 1),
    (5, 672, 160, True,  "hardswish", 2, 2),
    (5, 960, 160, True,  "hardswish", 1, 2),
    (5, 960, 160, True,  "hardswish", 1, 2),
]


def mobilenet_v3_large_backbone(pg, x):
    h = conv_bn_act_layer(pg, x, 16, 3, stride=2, act="hardswish")
    for (k, exp, cout, se, act, stride, dil) in _MOBILENET_V3_LARGE_DILATED:
        h = inverted_residual(pg, h, kernel=k, expanded=exp, cout=cout,
                              use_se=se, act=act, stride=stride, dilation=dil)
    h = conv_bn_act_layer(pg, h, 6 * 160, 1, act="hardswish")     # 960 channels
    return h


def aspp_pooling_branch(pg, x, cout):
    n, h, w, c = x.shape
    pooled = global_avg_pool(x.reshape(n, h * w, c)).reshape(n, c)
    wt, b = pg.conv(1, 1, c, cout)
    y = matmul_bias_act(pooled, wt.reshape(c, cout), b, act="relu")
    # bilinear upsample from 1x1 == constant broadcast
    return jnp.broadcast_to(y.reshape(n, 1, 1, cout), (n, h, w, cout))


def deeplab_head(pg, x, n_class):
    branches = [conv_bn_act_layer(pg, x, 256, 1, act="relu")]
    for rate in (12, 24, 36):
        branches.append(conv_bn_act_layer(pg, x, 256, 3, dilation=rate,
                                          act="relu"))
    branches.append(aspp_pooling_branch(pg, x, 256))
    h = jnp.concatenate(branches, axis=-1)                # [N,H,W,1280]
    h = conv_bn_act_layer(pg, h, 256, 1, act="relu")      # ASPP project (+Dropout: eval no-op)
    h = conv_bn_act_layer(pg, h, 256, 3, act="relu")
    h = conv_bn_act_layer(pg, h, n_class, 1, act="none")  # final 1x1 classifier
    return h


def _bilinear_matrix(out_size, in_size):
    # align_corners=False (half-pixel centers), matches F.interpolate
    if in_size == 1:
        return jnp.ones((out_size, 1), jnp.float32)
    src = (jnp.arange(out_size, dtype=jnp.float32) + 0.5) * (in_size / out_size) - 0.5
    src = jnp.clip(src, 0.0, in_size - 1)
    lo = jnp.clip(jnp.floor(src).astype(jnp.int32), 0, in_size - 2)
    frac = src - lo.astype(jnp.float32)
    rows = jnp.arange(out_size)
    mat = jnp.zeros((out_size, in_size), jnp.float32)
    mat = mat.at[rows, lo].add(1.0 - frac)
    mat = mat.at[rows, lo + 1].add(frac)
    return mat


def bilinear_resize(x, out_h, out_w):
    """x:[N,H,W,C] -> [N,out_h,out_w,C] via two separable Pallas matmuls."""
    n, h, w, c = x.shape
    ah = _bilinear_matrix(out_h, h)
    aw = _bilinear_matrix(out_w, w)
    t = jnp.transpose(x, (1, 0, 2, 3)).reshape(h, n * w * c)
    t = matmul_bias_act(ah, t, jnp.zeros((n * w * c,), jnp.float32), act="none")
    t = t.reshape(out_h, n, w, c)
    t = jnp.transpose(t, (2, 1, 0, 3)).reshape(w, n * out_h * c)
    t = matmul_bias_act(aw, t, jnp.zeros((n * out_h * c,), jnp.float32),
                        act="none")
    t = t.reshape(out_w, n, out_h, c)
    return jnp.transpose(t, (1, 2, 0, 3))


def deeplabv3_forward(x_nchw, n_class=21, seed=0):
    """Deeplabv3.forward: returns deeplabv3_mobilenet_v3_large(x)['out'] (NCHW)."""
    pg = ParamGen(jax.random.PRNGKey(seed))
    x = jnp.transpose(x_nchw.astype(jnp.float32), (0, 2, 3, 1))   # NCHW -> NHWC
    n, h, w, _ = x.shape
    feat = mobilenet_v3_large_backbone(pg, x)          # [N, H/16, W/16, 960]
    # TODO(synk): the reference module constructs DeepLabHead(2048, n_class),
    # which is inconsistent with the 960-channel MobileNetV3 backbone and would
    # raise in PyTorch; the head here is wired to the actual 960-channel features.
    logits = deeplab_head(pg, feat, n_class)           # [N, H/16, W/16, n_class]
    out = bilinear_resize(logits, h, w)                # bilinear, align_corners=False
    return jnp.transpose(out, (0, 3, 1, 2))            # NHWC -> NCHW


if __name__ == "__main__":
    key = jax.random.PRNGKey(0)
    x = jax.random.normal(key, (2, 3, 64, 64), jnp.float32)   # NCHW like PyTorch
    out = deeplabv3_forward(x, n_class=21)
    out = jax.block_until_ready(out)
    assert out.shape == (2, 21, 64, 64), out.shape
    assert bool(jnp.all(jnp.isfinite(out)))
    print("KERNEL_OK")
</pallas_src>

<mosaic_0001>
module attributes {stable_mosaic.version = 11 : i64} {
  func.func @_matmul_kernel(%arg0: i32, %arg1: i32, %arg2: i32, %arg3: memref<512x128xbf16, #tpu.memory_space<vmem>>, %arg4: memref<128x128xbf16, #tpu.memory_space<vmem>>, %arg5: memref<1x128xf32, #tpu.memory_space<vmem>>, %arg6: memref<512x128xf32, #tpu.memory_space<vmem>>) attributes {dimension_semantics = [#tpu.dimension_semantics<parallel>, #tpu.dimension_semantics<parallel>, #tpu.dimension_semantics<arbitrary>], iteration_bounds = array<i64: 4, 1, 1>, scalar_prefetch = 0 : i64, scratch_operands = 0 : i64, tpu.core_type = #tpu.core_type<tc>, window_params = [{transform_indices = @transform_0, window_bounds = array<i64: 512, 128>}, {transform_indices = @transform_1, window_bounds = array<i64: 128, 128>}, {transform_indices = @transform_2, window_bounds = array<i64: 1, 128>}, {transform_indices = @transform_3, window_bounds = array<i64: 512, 128>}]} {
    %c0_i32 = arith.constant 0 : i32
    %0 = arith.cmpi eq, %arg2, %c0_i32 : i32
    %1 = arith.extui %0 : i1 to i32
    %c0_i32_0 = arith.constant 0 : i32
    %2 = arith.cmpi ne, %1, %c0_i32_0 : i32
    scf.if %2 {
      %cst_10 = arith.constant 0.000000e+00 : f32
      %12 = vector.broadcast %cst_10 : f32 to vector<512x128xf32>
      %c0_11 = arith.constant 0 : index
      %c0_12 = arith.constant 0 : index
      %13 = vector.load %arg6[%c0_11, %c0_12] : memref<512x128xf32, #tpu.memory_space<vmem>>, vector<512x128xf32>
      tpu.vector_store %arg6[%c0_11, %c0_12], %12 {strides = array<i32>} : memref<512x128xf32, #tpu.memory_space<vmem>>, vector<512x128xf32>,
    } else {
    }
    %c0 = arith.constant 0 : index
    %c0_1 = arith.constant 0 : index
    %3 = vector.load %arg6[%c0, %c0_1] : memref<512x128xf32, #tpu.memory_space<vmem>>, vector<512x128xf32>
    %c0_2 = arith.constant 0 : index
    %c0_3 = arith.constant 0 : index
    %4 = vector.load %arg3[%c0_2, %c0_3] : memref<512x128xbf16, #tpu.memory_space<vmem>>, vector<512x128xbf16>
    %c0_4 = arith.constant 0 : index
    %c0_5 = arith.constant 0 : index
    %5 = vector.load %arg4[%c0_4, %c0_5] : memref<128x128xbf16, #tpu.memory_space<vmem>>, vector<128x128xbf16>
    %cst = arith.constant dense<0.000000e+00> : vector<512x128xf32>
    %6 = tpu.matmul %4, %5, %cst {dimension_numbers = #tpu.dot_dimension_numbers<[1], [0], [0], [1], [0, 0, 1, 1], [], []>} : vector<512x128xbf16>, vector<128x128xbf16>, vector<512x128xf32> -> vector<512x128xf32>
    %7 = arith.addf %3, %6 : vector<512x128xf32>
    %c0_6 = arith.constant 0 : index
    %c0_7 = arith.constant 0 : index
    %8 = vector.load %arg6[%c0_6, %c0_7] : memref<512x128xf32, #tpu.memory_space<vmem>>, vector<512x128xf32>
    tpu.vector_store %arg6[%c0_6, %c0_7], %7 {strides = array<i32>} : memref<512x128xf32, #tpu.memory_space<vmem>>, vector<512x128xf32>,
    %c0_i32_8 = arith.constant 0 : i32
    %9 = arith.cmpi eq, %arg2, %c0_i32_8 : i32
    %10 = arith.extui %9 : i1 to i32
    %c0_i32_9 = arith.constant 0 : i32
    %11 = arith.cmpi ne, %10, %c0_i32_9 : i32
    scf.if %11 {
      %c0_10 = arith.constant 0 : index
      %c0_11 = arith.constant 0 : index
      %12 = vector.load %arg6[%c0_10, %c0_11] : memref<512x128xf32, #tpu.memory_space<vmem>>, vector<512x128xf32>
      %c0_12 = arith.constant 0 : index
      %c0_13 = arith.constant 0 : index
      %13 = vector.load %arg5[%c0_12, %c0_13] : memref<1x128xf32, #tpu.memory_space<vmem>>, vector<1x128xf32>
      %14 = vector.broadcast %13 : vector<1x128xf32> to vector<512x128xf32>
      %15 = arith.addf %12, %14 : vector<512x128xf32>
      %cst_14 = arith.constant 3.000000e+00 : f32
      %16 = vector.broadcast %cst_14 : f32 to vector<512x128xf32>
      %17 = arith.addf %15, %16 : vector<512x128xf32>
      %cst_15 = arith.constant 0.000000e+00 : f32
      %cst_16 = arith.constant 6.000000e+00 : f32
      %18 = vector.broadcast %cst_15 : f32 to vector<512x128xf32>
      %19 = arith.maximumf %18, %17 : vector<512x128xf32>
      %20 = vector.broadcast %cst_16 : f32 to vector<512x128xf32>
      %21 = arith.minimumf %20, %19 : vector<512x128xf32>
      %22 = arith.mulf %15, %21 : vector<512x128xf32>
      %cst_17 = arith.constant 0.166666672 : f32
      %23 = vector.broadcast %cst_17 : f32 to vector<512x128xf32>
      %24 = arith.mulf %22, %23 : vector<512x128xf32>
      %c0_18 = arith.constant 0 : index
      %c0_19 = arith.constant 0 : index
      %25 = vector.load %arg6[%c0_18, %c0_19] : memref<512x128xf32, #tpu.memory_space<vmem>>, vector<512x128xf32>
      tpu.vector_store %arg6[%c0_18, %c0_19], %24 {strides = array<i32>} : memref<512x128xf32, #tpu.memory_space<vmem>>, vector<512x128xf32>,
    } else {
    }
    return
  }
  func.func @transform_0(%arg0: i32, %arg1: i32, %arg2: i32) -> (i32, i32) {
    %c0_i32 = arith.constant 0 : i32
    return %arg0, %arg2 : i32, i32
  }
  func.func @transform_1(%arg0: i32, %arg1: i32, %arg2: i32) -> (i32, i32) {
    %c0_i32 = arith.constant 0 : i32
    return %arg2, %arg1 : i32, i32
  }
  func.func @transform_2(%arg0: i32, %arg1: i32, %arg2: i32) -> (i32, i32) {
    %c0_i32 = arith.constant 0 : i32
    %c0_i32_0 = arith.constant 0 : i32
    return %c0_i32, %arg1 : i32, i32
  }
  func.func @transform_3(%arg0: i32, %arg1: i32, %arg2: i32) -> (i32, i32) {
    %c0_i32 = arith.constant 0 : i32
    return %arg0, %arg1 : i32, i32
  }
}

</mosaic_0001>

<bundles_post_ra>
// kernel: tpu_custom_call.1
= control target key start
LH: loop header
LB: loop body
LE: loop exit
PB: predicated region body
PF: predicated region fallthrough
CT: control target
= control target key end

     0   :  { %8 = vsyncpa [#allocation3], 0  ;;  %s2801_s0 = inlined_call_operand.hbm [shape: bf16[2048,128], index: 0, kind: input, shape index: {}]   ;;  %s2802_s1 = inlined_call_operand.hbm [shape: bf16[128,128], index: 1, kind: input, shape index: {}]   ;;  %s2803_s2 = inlined_call_operand.vmem [shape: f32[1,128], index: 2, kind: input, shape index: {}]   ;;  %s2804_s3 = inlined_call_operand.hbm [shape: f32[2048,128], index: 3, kind: output, shape index: {}]  }
   0x1   :  { %10 = vsyncpa [#allocation3 + $0x1], 0 }
   0x2   :  { %11 = vsyncpa [#allocation6], 0 }
   0x3   :  { %12 = vsyncpa [#allocation4], 0 }
   0x4   :  { %14 = vsyncpa [#allocation4 + $0x1], 0  ;;  %s2266_s12 = smov 0   ;;  %s2268_s13 = smov 0  }
   0x5   :  { %s2270_s14 = smov 0   ;;  %s2272_s15 = smov 0  }
   0x6   :  { %s2274_s16 = smov 0   ;;  %s2276_s17 = smov 0  }
   0x7 LB: > { %s1777_s18 = sadd.s32 4294967295, %s2237_s17   ;;  %s1778_s19 = sadd.s32 4294967294, %s2237_s17   ;;  %s2237_s17 = sphi %s2276_s17, %s20_s17   ;;  %s2233_s16 = sphi %s2274_s16, %s2827_s16   ;;  %s2229_s15 = sphi %s2272_s15, %s2826_s15   ;;  %s2225_s14 = sphi %s2270_s14, %s2825_s14   ;;  %s2221_s13 = sphi %s2268_s13, %s2824_s13   ;;  %s2217_s12 = sphi %s2266_s12, %s2823_s12  }
   0x8   : > { %p61_p0 = scmp.ne.s32.totalorder %s2221_s13, %s2217_s12  ;;  %p2300_p1 = scmp.eq.s32.totalorder %s1777_s18, 0 }
   0x9   : > { %p2304_p2 = scmp.eq.s32.totalorder %s1777_s18, 3  ;;  %p147_p3 = scmp.eq.s32.totalorder %s1778_s19, 3 }
   0xa   : > { %s2809_s20 = scalar_select %p2300_p1, 1, 0 }
   0xb   : > { %s2810_s21 = scalar_select %p2304_p2, 1, 0 }
   0xc   : > { %p2310_p4 = por %p2300_p1, %p61_p0  ;;  %p1779_p5 = scmp.ge.s32.totalorder %s2237_s17, 1 }
   0xd   : > { %p2315_p6 = por %p147_p3, %p61_p0  ;;  %p154_p7 = scmp.lt.s32.totalorder %s2237_s17, 5 }
   0xe   : > { %s2811_s22 = scalar_select %p2310_p4, 1, 0 }
   0xf   : > { %s2812_s23 = scalar_select %p2315_p6, 1, 0 }
  0x10   : > { %p2320_p8 = pnand %p1779_p5, %p154_p7  ;;  %s2239_s25 = smov [#allocation5]  }
  0x11   : > { %s170_s26 = sshll.u32 %s2239_s25, 4  ;;  %s39_s28 = sadd.s32 1, %s2233_s16  ;;  %s171_s26 = int_to_ptr.vmem [resolvable:$true] %s170_s26 }
  0x12   : > { %s2813_s24 = scalar_select %p2320_p8, 1, 0 }
  0x13   : > { %p1982_p9 = pneg %p2320_p8  ;;  %s2093_s4 = scalar_lea.hbm %s2802_s1, 1024 }
  0x14   : > { %p2094_p11 = scmp.ne.s32.totalorder %s2802_s1, %s2093_s4  ;;  %p2100_p3 = scmp.lt.u32.totalorder %s2093_s4, %s2802_s1 }
  0x15   : > { %p2328_p10 = pnand %p1982_p9, %p2300_p1 }
  0x17   : > { %p2095_p12 = pneg %p2328_p10 }
  0x19   : > { %p2096_p13 = pnand %p2095_p12, %p2094_p11 }
  0x1b   : > { %p2097_p0 = pneg %p2096_p13 }
  0x1d   : > { %p2102_p5 = pnand %p2100_p3, %p2097_p0 }
  0x1f   : > { %2105 = shalt.err (!%p2102_p5)
}
  0x20   : > { %s2106_s9 = scalar_lea.vmem %s171_s26, 1024  ;;  %p2114_p1 = scmp.lt.s32.totalorder %s171_s26, %s171_s26 }
  0x21   : > { %p2107_p7 = scmp.ne.s32.totalorder %s171_s26, %s2106_s9  ;;  %p2115_p4 = scmp.lt.s32.totalorder %s2106_s9, %s2106_s9 }
  0x23   : > { %p2109_p9 = pnand %p2107_p7, %p2095_p12  ;;  %p2116_p8 = por %p2115_p4, %p2114_p1 }
  0x25   : > { %p2110_p6 = pneg %p2109_p9 }
  0x27   : > { %p2117_p2 = pnand %p2116_p8, %p2110_p6 }
  0x29   : > { %2120 = shalt.err (!%p2117_p2)
}
  0x2a   : > { %s2240_s10 = smov 64   ;;  %s2241_s11 = smov 4  }
  0x2b   : > { %1985 = dma.hbm_to_vmem [thread:$0]  (!%p2328_p10), %s2802_s1, 1024, %s171_s26, [#allocation6], %s2240_s10, %s2240_s10, %s2241_s11  }
  0x2c   : > { %p41_p1 = scmp.ge.s32.totalorder %s39_s28, 4  ;;  %s48_s25 = sadd.s32 1, %s2225_s14 }
  0x2d   : > { %p55_p2 = scmp.ne.s32.totalorder %s2225_s14, %s2221_s13  ;;  %p56_p4 = scmp.eq.s32.totalorder %s2237_s17, 0 }
  0x2e   : > { %s2829_s28 = smov (%p41_p1, %s39_s28), 0  ;;  %p2816_p8 = scmp.ne.s32.totalorder %s2810_s21, 0 }
  0x2f   : > { %p2358_p6 = por %p56_p4, %p55_p2  ;;  %s43_s30 = ssub.s32 %s2233_s16, %s2829_s28 }
  0x30   : > { %p2364_p11 = por %p2816_p8, %p55_p2  ;;  %p1995_p12 = scmp.lt.s32.totalorder %s2237_s17, 4 }
  0x31   : > { %p46_p10 = scmp.eq.s32.totalorder %s43_s30, 0  ;;  %s190_s26 = sand.u32 1, %s2225_s14  }
  0x32   : > { %s1783_s4 = sshll.u32 %s190_s26, 8  ;;  %s1836_s6 = sshll.u32 %s2233_s16, 12 }
  0x33   : > { %s2373_s5 = scalar_select %p46_p10, %s2225_s14, %s48_s25  }
  0x34   : > { %s2379_s9 = scalar_lea.hbm %s2801_s0, %s1836_s6  ;;  %s194_s21 = scalar_lea.vmem [#allocation2], %s1783_s4 }
  0x35   : > { %s202_s18 = sshll.u32 %s194_s21, 4  ;;  %p2385_p13 = pnand %p1995_p12, %p2358_p6  ;;  %s2381_s18 = int_to_ptr.vmem [resolvable:$true] %s202_s18 }
  0x36   : > { %s2389_s25 = scalar_lea.sflag [#allocation3], %s190_s26  ;;  %s2121_s30 = scalar_lea.hbm %s2379_s9, 4096 }
  0x37   : > { %p2122_p0 = scmp.ne.s32.totalorder %s2379_s9, %s2121_s30  ;;  %p2123_p3 = pneg %p2385_p13 }
  0x38   : > { %s2126_s29 = scalar_lea.hbm %s2801_s0, 16384  ;;  %p2127_p9 = scmp.lt.u32.totalorder %s2379_s9, %s2801_s0 }
  0x39   : > { %p2124_p5 = pnand %p2123_p3, %p2122_p0  ;;  %p2128_p1 = scmp.lt.u32.totalorder %s2126_s29, %s2121_s30 }
  0x3a   : > { %p2130_p4 = scmp.lt.u32.totalorder %s2121_s30, %s2379_s9 }
  0x3b   : > { %p2125_p7 = pneg %p2124_p5  ;;  %p2129_p2 = por %p2128_p1, %p2127_p9 }
  0x3d   : > { %p2131_p6 = por %p2130_p4, %p2129_p2 }
  0x3f   : > { %p2132_p8 = pnand %p2131_p6, %p2125_p7 }
  0x41   : > { %2135 = shalt.err (!%p2132_p8)
}
  0x42   : > { %s2136_s26 = scalar_lea.vmem %s2381_s18, 4096  ;;  %s2242_s21 = smov [#allocation2]  }
  0x43   : > { %p2137_p12 = scmp.ne.s32.totalorder %s2381_s18, %s2136_s26  ;;  %s2141_s4 = sshll.u32 %s2242_s21, 4  ;;  %s2142_s4 = int_to_ptr.vmem [resolvable:$false] %s2141_s4 }
  0x44   : > { %s2143_s6 = scalar_lea.vmem %s2142_s4, 8192  ;;  %p2144_p5 = scmp.lt.s32.totalorder %s2381_s18, %s2142_s4 }
  0x45   : > { %p2139_p10 = pnand %p2137_p12, %p2123_p3  ;;  %p2145_p9 = scmp.lt.s32.totalorder %s2143_s6, %s2136_s26 }
  0x47   : > { %p2140_p0 = pneg %p2139_p10  ;;  %p2146_p1 = por %p2145_p9, %p2144_p5 }
  0x49   : > { %p2147_p2 = pnand %p2146_p1, %p2140_p0 }
  0x4b   : > { %2150 = shalt.err (!%p2147_p2)
}
  0x4c   : > { %1989 = dma.hbm_to_vmem [thread:$0]  (!%p2385_p13), %s2379_s9, 4096, %s2381_s18, %s2389_s25, %s2240_s10, %s2240_s10, %s2241_s11  }
  0x4d   : > { %p2819_p3 = scmp.ne.s32.totalorder %s2813_s24, 0 }
  0x4e   : > { %s2423_s30 = sand.u32 (!%p2819_p3), 1, %s2221_s13   ;;  %p2820_p7 = scmp.ne.s32.totalorder (!%p2819_p3), %s2811_s22, 0 }
  0x4f   : > { %214 = sbr.rel (%p2819_p3) target bundleno = 450 (0x1c2), region = 32  ;;  %s1787_s29 = sshll.u32 (!%p2819_p3), %s2423_s30, 8 }
  0x50   : > { %s217_s7 = scalar_lea.sflag (!%p2819_p3), [#allocation3], %s2423_s30  ;;  %s2427_s8 = scalar_lea.vmem (!%p2819_p3), [#allocation2], %s1787_s29 }
  0x56   : > { %2204 = dma.done.wait (%p2820_p7), %s217_s7, 4096  }
  0x57   : > { %2206 = vsyncadd (%p2820_p7), %s217_s7, 4294963200  ;;  %p2821_p13 = scmp.ne.s32.totalorder %s2809_s20, 0 }
  0x59   : > { %2208 = dma.done.wait (%p2821_p13), [#allocation6], 1024  }
  0x5a   : > { %2210 = vsyncadd (%p2821_p13), [#allocation6], 4294966272  ;;  %v2052_v0 = vld [vmem:[#allocation5] sm:$0xff]   ;;  %v2053_v1 = vld [vmem:[#allocation5 + $0x8] sm:$0xff]   ;;  %s1789_s24 = sshll.u32 %s2423_s30, 9  ;;  %s1837_s18 = sshll.u32 %s2229_s15, 13 }
  0x5b   : > { %1878 = vmatprep.subr.bf16.mxu0 %v2052_v0  ;;  %1958 = vmatprep.subr.bf16.mxu1 %v2052_v0  ;;  %v2054_v2 = vld [vmem:[#allocation5 + $0x10] sm:$0xff]   ;;  %v2055_v3 = vld [vmem:[#allocation5 + $0x18] sm:$0xff]   ;;  %v2060_v4 = vld [vmem:[%s2427_s8] sm:$0xff]   ;;  %s2485_s10 = scalar_lea.vmem [#allocation7], %s1789_s24  ;;  %s2745_s26 = scalar_lea.hbm %s2804_s3, %s1837_s18 }
  0x5c   : > { %1879 = vmatpush3.bf16.msra.mxu0 %v2052_v0  ;;  %1966 = vmatpush3.bf16.msra.mxu1 %v2052_v0  ;;  %v2061_v5 = vld [vmem:[%s2427_s8 + $0x80] sm:$0xff]   ;;  %v2057_v7 = vld [vmem:[#allocation5 + $0x28] sm:$0xff]   ;;  %v2058_v8 = vld [vmem:[#allocation5 + $0x30] sm:$0xff]   ;;  %s1663_s19 = sshll.u32 %s2485_s10, 4  ;;  %s1649_s21 = scalar_lea.sflag [#allocation4], %s2423_s30  ;;  %s2747_s19 = int_to_ptr.vmem [resolvable:$true] %s1663_s19 }
  0x5d   : > { %1880 = vmatprep.subr.bf16.mxu0 %v2053_v1  ;;  %1959 = vmatprep.subr.bf16.mxu1 %v2053_v1  ;;  %v2056_v6 = vld [vmem:[#allocation5 + $0x20] sm:$0xff]   ;;  %v2059_v9 = vld [vmem:[#allocation5 + $0x38] sm:$0xff]   ;;  %v2062_v10 = vld [vmem:[%s2427_s8 + $0x8] sm:$0xff]   ;;  %s2151_s4 = scalar_lea.vmem %s2747_s19, 8192  ;;  %s2243_s6 = smov [#allocation7]  }
  0x5e   : > { %1894 = vmatprep.mubr.bf16.mxu0 %v2060_v4  ;;  %1926 = vmatprep.mubr.bf16.mxu1 %v2061_v5  ;;  %v2063_v11 = vld [vmem:[%s2427_s8 + $0x88] sm:$0xff]   ;;  %v2064_v12 = vld [vmem:[%s2427_s8 + $0x10] sm:$0xff]   ;;  %v2066_v14 = vld [vmem:[%s2427_s8 + $0x18] sm:$0xff]   ;;  %p2152_p4 = scmp.ne.s32.totalorder %s2747_s19, %s2151_s4  ;;  %s2155_s29 = sshll.u32 %s2243_s6, 4  ;;  %s2156_s29 = int_to_ptr.vmem [resolvable:$false] %s2155_s29 }
  0x5f   : > { %v2065_v13 = vld [vmem:[%s2427_s8 + $0x90] sm:$0xff]   ;;  %v2067_v15 = vld [vmem:[%s2427_s8 + $0x98] sm:$0xff]   ;;  %v2068_v16 = vld [vmem:[%s2427_s8 + $0x20] sm:$0xff]   ;;  %s2157_s7 = scalar_lea.vmem %s2156_s29, 16384  ;;  %p2158_p12 = scmp.lt.s32.totalorder %s2747_s19, %s2156_s29 }
  0x60   : > { %1881 = vmatpush3.bf16.msra.mxu0 %v2053_v1  ;;  %1967 = vmatpush3.bf16.msra.mxu1 %v2053_v1  ;;  %v2069_v17 = vld [vmem:[%s2427_s8 + $0xa0] sm:$0xff]   ;;  %v2070_v18 = vld [vmem:[%s2427_s8 + $0x28] sm:$0xff]   ;;  %v2072_v20 = vld [vmem:[%s2427_s8 + $0x30] sm:$0xff]   ;;  %p2153_p6 = pnand %p2152_p4, %p2364_p11  ;;  %p2159_p10 = scmp.lt.s32.totalorder %s2157_s7, %s2151_s4 }
  0x61   : > { %1882 = vmatprep.subr.bf16.mxu0 %v2054_v2  ;;  %1960 = vmatprep.subr.bf16.mxu1 %v2054_v2  ;;  %v2071_v19 = vld [vmem:[%s2427_s8 + $0xa8] sm:$0xff]   ;;  %v2073_v21 = vld [vmem:[%s2427_s8 + $0xb0] sm:$0xff]   ;;  %v2074_v22 = vld [vmem:[%s2427_s8 + $0x38] sm:$0xff]  }
  0x62   : > { %v2075_v23 = vld [vmem:[%s2427_s8 + $0xb8] sm:$0xff]   ;;  %v2076_v24 = vld [vmem:[%s2427_s8 + $0x40] sm:$0xff]   ;;  %v2078_v26 = vld [vmem:[%s2427_s8 + $0x48] sm:$0xff]   ;;  %p2154_p8 = pneg %p2153_p6  ;;  %p2160_p0 = por %p2159_p10, %p2158_p12 }
  0x63   : > { %v2077_v25 = vld [vmem:[%s2427_s8 + $0xc0] sm:$0xff]   ;;  %v2079_v27 = vld [vmem:[%s2427_s8 + $0xc8] sm:$0xff]   ;;  %v2080_v28 = vld [vmem:[%s2427_s8 + $0x50] sm:$0xff]  }
  0x64   : > { %1883 = vmatpush3.bf16.msra.mxu0 %v2054_v2  ;;  %1968 = vmatpush3.bf16.msra.mxu1 %v2054_v2  ;;  %v2081_v29 = vld [vmem:[%s2427_s8 + $0xd0] sm:$0xff]   ;;  %v2082_v30 = vld [vmem:[%s2427_s8 + $0x58] sm:$0xff]   ;;  %v2084_v32 = vld [vmem:[%s2427_s8 + $0x60] sm:$0xff]   ;;  %p2161_p5 = pnand %p2160_p0, %p2154_p8 }
  0x65   : > { %1884 = vmatprep.subr.bf16.mxu0 %v2055_v3  ;;  %1961 = vmatprep.subr.bf16.mxu1 %v2055_v3  ;;  %v2083_v31 = vld [vmem:[%s2427_s8 + $0xd8] sm:$0xff]   ;;  %v2085_v33 = vld [vmem:[%s2427_s8 + $0xe0] sm:$0xff]   ;;  %v2086_v34 = vld [vmem:[%s2427_s8 + $0x68] sm:$0xff]  }
  0x66   : > { %v2087_v35 = vld [vmem:[%s2427_s8 + $0xe8] sm:$0xff]   ;;  %v2088_v36 = vld [vmem:[%s2427_s8 + $0x70] sm:$0xff]   ;;  %v2090_v38 = vld [vmem:[%s2427_s8 + $0x78] sm:$0xff]  }
  0x67   : > { %v2089_v37 = vld [vmem:[%s2427_s8 + $0xf0] sm:$0xff]   ;;  %v2091_v39 = vld [vmem:[%s2427_s8 + $0xf8] sm:$0xff]   ;;  %v2472_v41 = vld [vmem:[%s2803_s2] ss:$0 sm:$0xff] }
  0x68   : > { %1885 = vmatpush3.bf16.msra.mxu0 %v2055_v3  ;;  %1969 = vmatpush3.bf16.msra.mxu1 %v2055_v3 }
  0x69   : > { %1886 = vmatprep.subr.bf16.mxu0 %v2056_v6  ;;  %1962 = vmatprep.subr.bf16.mxu1 %v2056_v6 }
  0x6c   : > { %1887 = vmatpush3.bf16.msra.mxu0 %v2056_v6  ;;  %1970 = vmatpush3.bf16.msra.mxu1 %v2056_v6 }
  0x6d   : > { %1888 = vmatprep.subr.bf16.mxu0 %v2057_v7  ;;  %1963 = vmatprep.subr.bf16.mxu1 %v2057_v7 }
  0x70   : > { %1889 = vmatpush3.bf16.msra.mxu0 %v2057_v7  ;;  %1971 = vmatpush3.bf16.msra.mxu1 %v2057_v7 }
  0x71   : > { %1890 = vmatprep.subr.bf16.mxu0 %v2058_v8  ;;  %1964 = vmatprep.subr.bf16.mxu1 %v2058_v8 }
  0x74   : > { %1891 = vmatpush3.bf16.msra.mxu0 %v2058_v8  ;;  %1972 = vmatpush3.bf16.msra.mxu1 %v2058_v8 }
  0x75   : > { %1892 = vmatprep.subr.bf16.mxu0 %v2059_v9  ;;  %1965 = vmatprep.subr.bf16.mxu1 %v2059_v9 }
  0x78   : > { %1893 = vmatpush3.bf16.msra.mxu0 %v2059_v9  ;;  %1973 = vmatpush3.bf16.msra.mxu1 %v2059_v9 }
  0x7b   : > { %1895 = vmatmul.mubr.bf16.vlgmr.msra.gmra.mrb[0].mxu0 %v2062_v10  ;;  %1927 = vmatmul.mubr.bf16.vlgmr.msra.gmra.mrb[0].mxu1 %v2063_v11 }
  0x7c   : > { %1898 = vmatprep.mubr.bf16.mxu0 %v2064_v12  ;;  %1930 = vmatprep.mubr.bf16.mxu1 %v2065_v13 }
  0x83   : > { %1899 = vmatmul.mubr.bf16.gmra.mrb[4].mxu0 %v2066_v14  ;;  %1931 = vmatmul.mubr.bf16.gmra.mrb[4].mxu1 %v2067_v15 }
  0x84   : > { %1902 = vmatprep.mubr.bf16.mxu0 %v2068_v16  ;;  %1934 = vmatprep.mubr.bf16.mxu1 %v2069_v17 }
  0x8b   : > { %1903 = vmatmul.mubr.bf16.gmra.mrb[8].mxu0 %v2070_v18  ;;  %1935 = vmatmul.mubr.bf16.gmra.mrb[8].mxu1 %v2071_v19 }
  0x8c   : > { %1906 = vmatprep.mubr.bf16.mxu0 %v2072_v20  ;;  %1938 = vmatprep.mubr.bf16.mxu1 %v2073_v21 }
  0x93   : > { %1907 = vmatmul.mubr.bf16.gmra.mrb[12].mxu0 %v2074_v22  ;;  %1939 = vmatmul.mubr.bf16.gmra.mrb[12].mxu1 %v2075_v23 }
  0x94   : > { %1910 = vmatprep.mubr.bf16.mxu0 %v2076_v24  ;;  %1942 = vmatprep.mubr.bf16.mxu1 %v2077_v25 }
  0x9b   : > { %1911 = vmatmul.mubr.bf16.gmra.mrb[16].mxu0 %v2078_v26  ;;  %1943 = vmatmul.mubr.bf16.gmra.mrb[16].mxu1 %v2079_v27 }
  0x9c   : > { %1914 = vmatprep.mubr.bf16.mxu0 %v2080_v28  ;;  %1946 = vmatprep.mubr.bf16.mxu1 %v2081_v29 }
  0xa3   : > { %1915 = vmatmul.mubr.bf16.gmra.mrb[20].mxu0 %v2082_v30  ;;  %1947 = vmatmul.mubr.bf16.gmra.mrb[20].mxu1 %v2083_v31 }
  0xa4   : > { %1918 = vmatprep.mubr.bf16.mxu0 %v2084_v32  ;;  %1950 = vmatprep.mubr.bf16.mxu1 %v2085_v33 }
  0xab   : > { %1919 = vmatmul.mubr.bf16.gmra.mrb[24].mxu0 %v2086_v34  ;;  %1951 = vmatmul.mubr.bf16.gmra.mrb[24].mxu1 %v2087_v35 }
  0xac   : > { %1922 = vmatprep.mubr.bf16.mxu0 %v2088_v36  ;;  %1954 = vmatprep.mubr.bf16.mxu1 %v2089_v37 }
  0xb3   : > { %1923 = vmatmul.mubr.bf16.gmra.mrb[28].mxu0 %v2090_v38  ;;  %1955 = vmatmul.mubr.bf16.gmra.mrb[28].mxu1 %v2091_v39 }
 0x14e   : > { %v1896_v40 = vpop.f32.mrb[0].mxu0  ;;  %v1928_v42 = vpop.f32.mrb[0].mxu1 }
 0x14f   : > { %v743_v43 = vpop.f32.mrb[1].mxu0  ;;  %v871_v44 = vpop.f32.mrb[1].mxu1  ;;  %v1202_v47 = vadd.f32 %v1896_v40, %v2472_v41  ;;  %v1234_v48 = vadd.f32 %v1928_v42, %v2472_v41 }
 0x150   : > { %v1897_v45 = vpop.f32.mrb[2].mxu0  ;;  %v1929_v46 = vpop.f32.mrb[2].mxu1  ;;  %v1200_v51 = vadd.f32 %v2472_v41, %v743_v43  ;;  %v1232_v52 = vadd.f32 %v2472_v41, %v871_v44 }
 0x151   : > { %v746_v49 = vpop.f32.mrb[3].mxu0  ;;  %v874_v50 = vpop.f32.mrb[3].mxu1  ;;  %v1266_v53 = vadd.f32 3.0, %v1202_v47  ;;  %v1298_v54 = vadd.f32 3.0, %v1234_v48  ;;  %v1203_v55 = vadd.f32 %v1897_v45, %v2472_v41  ;;  %v1235_v56 = vadd.f32 %v1929_v46, %v2472_v41 }
 0x152   : > { %v1264_v57 = vadd.f32 3.0, %v1200_v51  ;;  %v1296_v58 = vadd.f32 3.0, %v1232_v52  ;;  %v1201_v59 = vadd.f32 %v2472_v41, %v746_v49  ;;  %v1233_v60 = vadd.f32 %v2472_v41, %v874_v50 }
 0x153   : > { %v1330_v61 = vmax.f32 %v1266_v53, 0.0  ;;  %v1362_v62 = vmax.f32 %v1298_v54, 0.0  ;;  %v1267_v63 = vadd.f32 3.0, %v1203_v55  ;;  %v1299_v0 = vadd.f32 3.0, %v1235_v56 }
 0x154   : > { %v1328_v1 = vmax.f32 %v1264_v57, 0.0  ;;  %v1360_v2 = vmax.f32 %v1296_v58, 0.0  ;;  %v1265_v3 = vadd.f32 3.0, %v1201_v59  ;;  %v1297_v4 = vadd.f32 3.0, %v1233_v60 }
 0x155   : > { %v1394_v7 = vmin.f32 %v1330_v61, 6.0  ;;  %v1426_v8 = vmin.f32 %v1362_v62, 6.0  ;;  %v1331_v9 = vmax.f32 %v1267_v63, 0.0  ;;  %v1363_v10 = vmax.f32 %v1299_v0, 0.0 }
 0x156   : > { %v1900_v5 = vpop.f32.mrb[4].mxu0  ;;  %v1932_v6 = vpop.f32.mrb[4].mxu1  ;;  %v1392_v13 = vmin.f32 %v1328_v1, 6.0  ;;  %v1424_v14 = vmin.f32 %v1360_v2, 6.0  ;;  %v1329_v15 = vmax.f32 %v1265_v3, 0.0  ;;  %v1361_v16 = vmax.f32 %v1297_v4, 0.0 }
 0x157   : > { %v759_v11 = vpop.f32.mrb[5].mxu0  ;;  %v887_v12 = vpop.f32.mrb[5].mxu1  ;;  %v1458_v19 = vmul.f32 %v1394_v7, %v1202_v47  ;;  %v1490_v20 = vmul.f32 %v1426_v8, %v1234_v48  ;;  %v1395_v21 = vmin.f32 %v1331_v9, 6.0  ;;  %v1427_v22 = vmin.f32 %v1363_v10, 6.0 }
 0x158   : > { %v1901_v17 = vpop.f32.mrb[6].mxu0  ;;  %v1933_v18 = vpop.f32.mrb[6].mxu1  ;;  %v1456_v25 = vmul.f32 %v1392_v13, %v1200_v51  ;;  %v1488_v26 = vmul.f32 %v1424_v14, %v1232_v52  ;;  %v1393_v27 = vmin.f32 %v1329_v15, 6.0  ;;  %v1425_v28 = vmin.f32 %v1361_v16, 6.0 }
 0x159   : > { %v762_v23 = vpop.f32.mrb[7].mxu0  ;;  %v890_v24 = vpop.f32.mrb[7].mxu1  ;;  %v1522_v29 = vmul.f32 0.16666667, %v1458_v19  ;;  %v1554_v30 = vmul.f32 0.16666667, %v1490_v20  ;;  %v1459_v31 = vmul.f32 %v1395_v21, %v1203_v55  ;;  %v1491_v32 = vmul.f32 %v1427_v22, %v1235_v56 }
 0x15a   : > { %v1520_v33 = vmul.f32 0.16666667, %v1456_v25  ;;  %v1552_v34 = vmul.f32 0.16666667, %v1488_v26  ;;  %v1457_v35 = vmul.f32 %v1393_v27, %v1201_v59  ;;  %v1489_v36 = vmul.f32 %v1425_v28, %v1233_v60 }
 0x15b   : > { %1586 = vst [vmem:[%s2485_s10 + $0x10] sm:$0xff] %v1522_v29  ;;  %1618 = vst [vmem:[%s2485_s10 + $0x110] sm:$0xff] %v1554_v30  ;;  %v1523_v37 = vmul.f32 0.16666667, %v1459_v31  ;;  %v1555_v38 = vmul.f32 0.16666667, %v1491_v32  ;;  %v1206_v44 = vadd.f32 %v1900_v5, %v2472_v41  ;;  %v1238_v45 = vadd.f32 %v1932_v6, %v2472_v41 }
 0x15c   : > { %1584 = vst [vmem:[%s2485_s10] sm:$0xff] %v1520_v33  ;;  %1616 = vst [vmem:[%s2485_s10 + $0x100] sm:$0xff] %v1552_v34  ;;  %v1521_v39 = vmul.f32 0.16666667, %v1457_v35  ;;  %v1553_v40 = vmul.f32 0.16666667, %v1489_v36  ;;  %v1204_v48 = vadd.f32 %v2472_v41, %v759_v11  ;;  %v1236_v49 = vadd.f32 %v2472_v41, %v887_v12 }
 0x15d   : > { %1587 = vst [vmem:[%s2485_s10 + $0x18] sm:$0xff] %v1523_v37  ;;  %1619 = vst [vmem:[%s2485_s10 + $0x118] sm:$0xff] %v1555_v38  ;;  %v1270_v52 = vadd.f32 3.0, %v1206_v44  ;;  %v1302_v53 = vadd.f32 3.0, %v1238_v45  ;;  %v1207_v54 = vadd.f32 %v1901_v17, %v2472_v41  ;;  %v1239_v55 = vadd.f32 %v1933_v18, %v2472_v41 }
 0x15e   : > { %v2491_v42 = vpop.f32.mrb[8].mxu0  ;;  %v2493_v43 = vpop.f32.mrb[8].mxu1  ;;  %1585 = vst [vmem:[%s2485_s10 + $0x8] sm:$0xff] %v1521_v39  ;;  %1617 = vst [vmem:[%s2485_s10 + $0x108] sm:$0xff] %v1553_v40  ;;  %v1268_v58 = vadd.f32 3.0, %v1204_v48  ;;  %v1300_v59 = vadd.f32 3.0, %v1236_v49  ;;  %v1205_v60 = vadd.f32 %v2472_v41, %v762_v23  ;;  %v1237_v61 = vadd.f32 %v2472_v41, %v890_v24 }
 0x15f   : > { %v2499_v46 = vpop.f32.mrb[9].mxu0  ;;  %v2501_v47 = vpop.f32.mrb[9].mxu1  ;;  %v1334_v62 = vmax.f32 %v1270_v52, 0.0  ;;  %v1366_v63 = vmax.f32 %v1302_v53, 0.0  ;;  %v1271_v0 = vadd.f32 3.0, %v1207_v54  ;;  %v1303_v1 = vadd.f32 3.0, %v1239_v55 }
 0x160   : > { %v2507_v50 = vpop.f32.mrb[10].mxu0  ;;  %v2509_v51 = vpop.f32.mrb[10].mxu1  ;;  %v1332_v2 = vmax.f32 %v1268_v58, 0.0  ;;  %v1364_v3 = vmax.f32 %v1300_v59, 0.0  ;;  %v1269_v4 = vadd.f32 3.0, %v1205_v60  ;;  %v1301_v5 = vadd.f32 3.0, %v1237_v61 }
 0x161   : > { %v2513_v56 = vpop.f32.mrb[11].mxu0  ;;  %v2515_v57 = vpop.f32.mrb[11].mxu1  ;;  %v1398_v6 = vmin.f32 %v1334_v62, 6.0  ;;  %v1430_v7 = vmin.f32 %v1366_v63, 6.0  ;;  %v1335_v8 = vmax.f32 %v1271_v0, 0.0  ;;  %v1367_v9 = vmax.f32 %v1303_v1, 0.0 }
 0x162   : > { %v1396_v10 = vmin.f32 %v1332_v2, 6.0  ;;  %v1428_v11 = vmin.f32 %v1364_v3, 6.0  ;;  %v1333_v12 = vmax.f32 %v1269_v4, 0.0  ;;  %v1365_v13 = vmax.f32 %v1301_v5, 0.0 }
 0x163   : > { %v1462_v16 = vmul.f32 %v1398_v6, %v1206_v44  ;;  %v1494_v17 = vmul.f32 %v1430_v7, %v1238_v45  ;;  %v1399_v18 = vmin.f32 %v1335_v8, 6.0  ;;  %v1431_v19 = vmin.f32 %v1367_v9, 6.0 }
 0x164   : > { %v1460_v22 = vmul.f32 %v1396_v10, %v1204_v48  ;;  %v1492_v23 = vmul.f32 %v1428_v11, %v1236_v49  ;;  %v1397_v24 = vmin.f32 %v1333_v12, 6.0  ;;  %v1429_v25 = vmin.f32 %v1365_v13, 6.0 }
 0x165   : > { %v1526_v28 = vmul.f32 0.16666667, %v1462_v16  ;;  %v1558_v29 = vmul.f32 0.16666667, %v1494_v17  ;;  %v1463_v30 = vmul.f32 %v1399_v18, %v1207_v54  ;;  %v1495_v31 = vmul.f32 %v1431_v19, %v1239_v55 }
 0x166   : > { %v2519_v14 = vpop.f32.mrb[12].mxu0  ;;  %v2521_v15 = vpop.f32.mrb[12].mxu1  ;;  %v1524_v34 = vmul.f32 0.16666667, %v1460_v22  ;;  %v1556_v35 = vmul.f32 0.16666667, %v1492_v23  ;;  %v1461_v36 = vmul.f32 %v1397_v24, %v1205_v60  ;;  %v1493_v37 = vmul.f32 %v1429_v25, %v1237_v61 }
 0x167   : > { %v2523_v20 = vpop.f32.mrb[13].mxu0  ;;  %v2525_v21 = vpop.f32.mrb[13].mxu1  ;;  %1590 = vst [vmem:[%s2485_s10 + $0x30] sm:$0xff] %v1526_v28  ;;  %1622 = vst [vmem:[%s2485_s10 + $0x130] sm:$0xff] %v1558_v29  ;;  %v1527_v38 = vmul.f32 0.16666667, %v1463_v30  ;;  %v1210_v45 = vadd.f32 %v2491_v42, %v2472_v41  ;;  %v1242_v48 = vadd.f32 %v2493_v43, %v2472_v41  ;;  %v1208_v49 = vadd.f32 %v2472_v41, %v2499_v46 }
 0x168   : > { %v2527_v26 = vpop.f32.mrb[14].mxu0  ;;  %v2529_v27 = vpop.f32.mrb[14].mxu1  ;;  %v1559_v39 = vmul.f32 0.16666667, %v1495_v31  ;;  %1588 = vst [vmem:[%s2485_s10 + $0x20] sm:$0xff] %v1524_v34  ;;  %1620 = vst [vmem:[%s2485_s10 + $0x120] sm:$0xff] %v1556_v35  ;;  %v1240_v52 = vadd.f32 %v2472_v41, %v2501_v47  ;;  %v1211_v42 = vadd.f32 %v2507_v50, %v2472_v41  ;;  %v1243_v43 = vadd.f32 %v2509_v51, %v2472_v41 }
 0x169   : > { %v2531_v32 = vpop.f32.mrb[15].mxu0  ;;  %v2533_v33 = vpop.f32.mrb[15].mxu1  ;;  %v1525_v40 = vmul.f32 0.16666667, %v1461_v36  ;;  %v1557_v44 = vmul.f32 0.16666667, %v1493_v37  ;;  %v1209_v47 = vadd.f32 %v2472_v41, %v2513_v56  ;;  %v1241_v62 = vadd.f32 %v2472_v41, %v2515_v57 }
 0x16a   : > { %1591 = vst [vmem:[%s2485_s10 + $0x38] sm:$0xff] %v1527_v38  ;;  %1623 = vst [vmem:[%s2485_s10 + $0x138] sm:$0xff] %v1559_v39  ;;  %v1274_v55 = vadd.f32 3.0, %v1210_v45  ;;  %v1306_v58 = vadd.f32 3.0, %v1242_v48  ;;  %v1272_v46 = vadd.f32 3.0, %v1208_v49  ;;  %v1304_v61 = vadd.f32 3.0, %v1240_v52 }
 0x16b   : > { %1589 = vst [vmem:[%s2485_s10 + $0x28] sm:$0xff] %v1525_v40  ;;  %1621 = vst [vmem:[%s2485_s10 + $0x128] sm:$0xff] %v1557_v44  ;;  %v1275_v2 = vadd.f32 3.0, %v1211_v42  ;;  %v1307_v51 = vadd.f32 3.0, %v1243_v43  ;;  %v1273_v7 = vadd.f32 3.0, %v1209_v47  ;;  %v1305_v8 = vadd.f32 3.0, %v1241_v62 }
 0x16c   : > { %v1338_v50 = vmax.f32 %v1274_v55, 0.0  ;;  %v1370_v1 = vmax.f32 %v1306_v58, 0.0  ;;  %v1336_v5 = vmax.f32 %v1272_v46, 0.0  ;;  %v1368_v6 = vmax.f32 %v1304_v61, 0.0 }
 0x16d   : > { %v1339_v10 = vmax.f32 %v1275_v2, 0.0  ;;  %v1371_v57 = vmax.f32 %v1307_v51, 0.0  ;;  %v1337_v13 = vmax.f32 %v1273_v7, 0.0  ;;  %v1369_v16 = vmax.f32 %v1305_v8, 0.0 }
 0x16e   : > { %v2551_v53 = vpop.f32.mrb[16].mxu0  ;;  %v2553_v54 = vpop.f32.mrb[16].mxu1  ;;  %v1402_v56 = vmin.f32 %v1338_v50, 6.0  ;;  %v1434_v9 = vmin.f32 %v1370_v1, 6.0  ;;  %v1400_v11 = vmin.f32 %v1336_v5, 6.0  ;;  %v1432_v12 = vmin.f32 %v1368_v6, 6.0 }
 0x16f   : > { %v2559_v59 = vpop.f32.mrb[17].mxu0  ;;  %v2561_v60 = vpop.f32.mrb[17].mxu1  ;;  %v1403_v19 = vmin.f32 %v1339_v10, 6.0  ;;  %v1435_v22 = vmin.f32 %v1371_v57, 6.0  ;;  %v1401_v25 = vmin.f32 %v1337_v13, 6.0  ;;  %v1433_v28 = vmin.f32 %v1369_v16, 6.0 }
 0x170   : > { %v2567_v63 = vpop.f32.mrb[18].mxu0  ;;  %v2569_v0 = vpop.f32.mrb[18].mxu1  ;;  %v1466_v17 = vmul.f32 %v1402_v56, %v1210_v45  ;;  %v1498_v18 = vmul.f32 %v1434_v9, %v1242_v48  ;;  %v1464_v23 = vmul.f32 %v1400_v11, %v1208_v49  ;;  %v1496_v24 = vmul.f32 %v1432_v12, %v1240_v52 }
 0x171   : > { %v2571_v3 = vpop.f32.mrb[19].mxu0  ;;  %v2573_v4 = vpop.f32.mrb[19].mxu1  ;;  %v1467_v35 = vmul.f32 %v1403_v19, %v1211_v42  ;;  %v1499_v36 = vmul.f32 %v1435_v22, %v1243_v43  ;;  %v1465_v44 = vmul.f32 %v1401_v25, %v1209_v47  ;;  %v1497_v45 = vmul.f32 %v1433_v28, %v1241_v62 }
 0x172   : > { %v1530_v31 = vmul.f32 0.16666667, %v1466_v17  ;;  %v1562_v34 = vmul.f32 0.16666667, %v1498_v18  ;;  %v1528_v39 = vmul.f32 0.16666667, %v1464_v23  ;;  %v1214_v61 = vadd.f32 %v2519_v14, %v2472_v41 }
 0x173   : > { %v1560_v40 = vmul.f32 0.16666667, %v1496_v24  ;;  %v1531_v52 = vmul.f32 0.16666667, %v1467_v35  ;;  %v1563_v55 = vmul.f32 0.16666667, %v1499_v36  ;;  %v1246_v47 = vadd.f32 %v2521_v15, %v2472_v41 }
 0x174   : > { %1594 = vst [vmem:[%s2485_s10 + $0x50] sm:$0xff] %v1530_v31  ;;  %1626 = vst [vmem:[%s2485_s10 + $0x150] sm:$0xff] %v1562_v34  ;;  %v1529_v43 = vmul.f32 0.16666667, %v1465_v44  ;;  %v1561_v46 = vmul.f32 0.16666667, %v1497_v45  ;;  %v1212_v62 = vadd.f32 %v2472_v41, %v2523_v20  ;;  %v1244_v50 = vadd.f32 %v2472_v41, %v2525_v21 }
 0x175   : > { %1592 = vst [vmem:[%s2485_s10 + $0x40] sm:$0xff] %v1528_v39  ;;  %1624 = vst [vmem:[%s2485_s10 + $0x140] sm:$0xff] %v1560_v40  ;;  %v1278_v1 = vadd.f32 3.0, %v1214_v61  ;;  %v1310_v2 = vadd.f32 3.0, %v1246_v47  ;;  %v1215_v51 = vadd.f32 %v2527_v26, %v2472_v41  ;;  %v1247_v5 = vadd.f32 %v2529_v27, %v2472_v41 }
 0x176   : > { %v2575_v29 = vpop.f32.mrb[20].mxu0  ;;  %v2577_v30 = vpop.f32.mrb[20].mxu1  ;;  %1595 = vst [vmem:[%s2485_s10 + $0x58] sm:$0xff] %v1531_v52  ;;  %1627 = vst [vmem:[%s2485_s10 + $0x158] sm:$0xff] %v1563_v55  ;;  %v1276_v14 = vadd.f32 3.0, %v1212_v62  ;;  %v1308_v6 = vadd.f32 3.0, %v1244_v50  ;;  %v1213_v15 = vadd.f32 %v2472_v41, %v2531_v32  ;;  %v1245_v7 = vadd.f32 %v2472_v41, %v2533_v33 }
 0x177   : > { %v2579_v37 = vpop.f32.mrb[21].mxu0  ;;  %v2581_v38 = vpop.f32.mrb[21].mxu1  ;;  %1593 = vst [vmem:[%s2485_s10 + $0x48] sm:$0xff] %v1529_v43  ;;  %1625 = vst [vmem:[%s2485_s10 + $0x148] sm:$0xff] %v1561_v46  ;;  %v1342_v21 = vmax.f32 %v1278_v1, 0.0  ;;  %v1374_v56 = vmax.f32 %v1310_v2, 0.0 }
 0x178   : > { %v2583_v48 = vpop.f32.mrb[22].mxu0  ;;  %v2585_v49 = vpop.f32.mrb[22].mxu1  ;;  %v1279_v9 = vadd.f32 3.0, %v1215_v51  ;;  %v1311_v10 = vadd.f32 3.0, %v1247_v5  ;;  %v1340_v27 = vmax.f32 %v1276_v14, 0.0  ;;  %v1372_v11 = vmax.f32 %v1308_v6, 0.0 }
 0x179   : > { %v2589_v58 = vpop.f32.mrb[23].mxu0  ;;  %v2591_v42 = vpop.f32.mrb[23].mxu1  ;;  %v1277_v12 = vadd.f32 3.0, %v1213_v15  ;;  %v1309_v13 = vadd.f32 3.0, %v1245_v7  ;;  %v1406_v33 = vmin.f32 %v1342_v21, 6.0  ;;  %v1438_v17 = vmin.f32 %v1374_v56, 6.0 }
 0x17a   : > { %v1343_v18 = vmax.f32 %v1279_v9, 0.0  ;;  %v1375_v19 = vmax.f32 %v1311_v10, 0.0  ;;  %v1404_v24 = vmin.f32 %v1340_v27, 6.0  ;;  %v1436_v25 = vmin.f32 %v1372_v11, 6.0 }
 0x17b   : > { %v1341_v28 = vmax.f32 %v1277_v12, 0.0  ;;  %v1373_v31 = vmax.f32 %v1309_v13, 0.0  ;;  %v1470_v34 = vmul.f32 %v1406_v33, %v1214_v61  ;;  %v1502_v35 = vmul.f32 %v1438_v17, %v1246_v47 }
 0x17c   : > { %v1407_v36 = vmin.f32 %v1343_v18, 6.0  ;;  %v1439_v39 = vmin.f32 %v1375_v19, 6.0  ;;  %v1468_v40 = vmul.f32 %v1404_v24, %v1212_v62  ;;  %v1500_v44 = vmul.f32 %v1436_v25, %v1244_v50 }
 0x17d   : > { %v1405_v45 = vmin.f32 %v1341_v28, 6.0  ;;  %v1437_v52 = vmin.f32 %v1373_v31, 6.0  ;;  %v1534_v55 = vmul.f32 0.16666667, %v1470_v34  ;;  %v1566_v43 = vmul.f32 0.16666667, %v1502_v35 }
 0x17e   : > { %v2615_v20 = vpop.f32.mrb[24].mxu0  ;;  %v2617_v8 = vpop.f32.mrb[24].mxu1  ;;  %v1471_v46 = vmul.f32 %v1407_v36, %v1215_v51  ;;  %v1503_v1 = vmul.f32 %v1439_v39, %v1247_v5  ;;  %v1532_v2 = vmul.f32 0.16666667, %v1468_v40  ;;  %v1564_v14 = vmul.f32 0.16666667, %v1500_v44 }
 0x17f   : > { %v2619_v26 = vpop.f32.mrb[25].mxu0  ;;  %v2621_v57 = vpop.f32.mrb[25].mxu1  ;;  %v1469_v6 = vmul.f32 %v1405_v45, %v1213_v15  ;;  %v1501_v61 = vmul.f32 %v1437_v52, %v1245_v7  ;;  %1598 = vst [vmem:[%s2485_s10 + $0x70] sm:$0xff] %v1534_v55  ;;  %1630 = vst [vmem:[%s2485_s10 + $0x170] sm:$0xff] %v1566_v43  ;;  %v1218_v10 = vadd.f32 %v2551_v53, %v2472_v41 }
 0x180   : > { %v2623_v32 = vpop.f32.mrb[26].mxu0  ;;  %v2625_v16 = vpop.f32.mrb[26].mxu1  ;;  %v1535_v62 = vmul.f32 0.16666667, %v1471_v46  ;;  %v1567_v50 = vmul.f32 0.16666667, %v1503_v1  ;;  %v1250_v27 = vadd.f32 %v2553_v54, %v2472_v41  ;;  %v1216_v13 = vadd.f32 %v2472_v41, %v2559_v59 }
 0x181   : > { %v2627_v22 = vpop.f32.mrb[27].mxu0  ;;  %v2629_v23 = vpop.f32.mrb[27].mxu1  ;;  %1596 = vst [vmem:[%s2485_s10 + $0x60] sm:$0xff] %v1532_v2  ;;  %1628 = vst [vmem:[%s2485_s10 + $0x160] sm:$0xff] %v1564_v14  ;;  %v1533_v5 = vmul.f32 0.16666667, %v1469_v6  ;;  %v1248_v33 = vadd.f32 %v2472_v41, %v2561_v60  ;;  %v1219_v53 = vadd.f32 %v2567_v63, %v2472_v41  ;;  %v1251_v54 = vadd.f32 %v2569_v0, %v2472_v41 }
 0x182   : > { %v1565_v15 = vmul.f32 0.16666667, %v1501_v61  ;;  %1599 = vst [vmem:[%s2485_s10 + $0x78] sm:$0xff] %v1535_v62  ;;  %1631 = vst [vmem:[%s2485_s10 + $0x178] sm:$0xff] %v1567_v50  ;;  %v1282_v17 = vadd.f32 3.0, %v1218_v10  ;;  %v1314_v18 = vadd.f32 3.0, %v1250_v27  ;;  %v1217_v25 = vadd.f32 %v2472_v41, %v2571_v3 }
 0x183   : > { %1597 = vst [vmem:[%s2485_s10 + $0x68] sm:$0xff] %v1533_v5  ;;  %v1280_v19 = vadd.f32 3.0, %v1216_v13  ;;  %v1312_v24 = vadd.f32 3.0, %v1248_v33  ;;  %v1249_v28 = vadd.f32 %v2472_v41, %v2573_v4  ;;  %v1283_v34 = vadd.f32 3.0, %v1219_v53 }
 0x184   : > { %1629 = vst [vmem:[%s2485_s10 + $0x168] sm:$0xff] %v1565_v15  ;;  %v1346_v59 = vmax.f32 %v1282_v17, 0.0  ;;  %v1378_v31 = vmax.f32 %v1314_v18, 0.0  ;;  %v1315_v60 = vadd.f32 3.0, %v1251_v54  ;;  %v1281_v39 = vadd.f32 3.0, %v1217_v25 }
 0x185   : > { %v1344_v35 = vmax.f32 %v1280_v19, 0.0  ;;  %v1376_v36 = vmax.f32 %v1312_v24, 0.0  ;;  %v1313_v40 = vadd.f32 3.0, %v1249_v28  ;;  %v1347_v45 = vmax.f32 %v1283_v34, 0.0 }
 0x186   : > { %v2631_v47 = vpop.f32.mrb[28].mxu0  ;;  %v2633_v21 = vpop.f32.mrb[28].mxu1  ;;  %v1410_v63 = vmin.f32 %v1346_v59, 6.0  ;;  %v1442_v44 = vmin.f32 %v1378_v31, 6.0  ;;  %v1379_v0 = vmax.f32 %v1315_v60, 0.0  ;;  %v1345_v43 = vmax.f32 %v1281_v39, 0.0 }
 0x187   : > { %v2637_v56 = vpop.f32.mrb[29].mxu0  ;;  %v2639_v51 = vpop.f32.mrb[29].mxu1  ;;  %v1408_v52 = vmin.f32 %v1344_v35, 6.0  ;;  %v1440_v55 = vmin.f32 %v1376_v36, 6.0  ;;  %v1377_v46 = vmax.f32 %v1313_v40, 0.0  ;;  %v1411_v4 = vmin.f32 %v1347_v45, 6.0 }
 0x188   : > { %v2643_v7 = vpop.f32.mrb[30].mxu0  ;;  %v2645_v9 = vpop.f32.mrb[30].mxu1  ;;  %v1474_v3 = vmul.f32 %v1410_v63, %v1218_v10  ;;  %v1506_v1 = vmul.f32 %v1442_v44, %v1250_v27  ;;  %v1443_v2 = vmin.f32 %v1379_v0, 6.0  ;;  %v1409_v61 = vmin.f32 %v1345_v43, 6.0 }
 0x189   : > { %v2653_v11 = vpop.f32.mrb[31].mxu0  ;;  %v2655_v12 = vpop.f32.mrb[31].mxu1  ;;  %v1472_v14 = vmul.f32 %v1408_v52, %v1216_v13  ;;  %v1504_v6 = vmul.f32 %v1440_v55, %v1248_v33  ;;  %v1441_v62 = vmin.f32 %v1377_v46, 6.0  ;;  %v1475_v15 = vmul.f32 %v1411_v4, %v1219_v53 }
 0x18a   : > { %v1538_v50 = vmul.f32 0.16666667, %v1474_v3  ;;  %v1570_v5 = vmul.f32 0.16666667, %v1506_v1  ;;  %v1507_v17 = vmul.f32 %v1443_v2, %v1251_v54  ;;  %v1473_v27 = vmul.f32 %v1409_v61, %v1217_v25 }
 0x18b   : > { %v1536_v18 = vmul.f32 0.16666667, %v1472_v14  ;;  %v1568_v10 = vmul.f32 0.16666667, %v1504_v6  ;;  %v1505_v19 = vmul.f32 %v1441_v62, %v1249_v28  ;;  %v1539_v13 = vmul.f32 0.16666667, %v1475_v15 }
 0x18c   : > { %1602 = vst [vmem:[%s2485_s10 + $0x90] sm:$0xff] %v1538_v50  ;;  %1634 = vst [vmem:[%s2485_s10 + $0x190] sm:$0xff] %v1570_v5  ;;  %v1571_v24 = vmul.f32 0.16666667, %v1507_v17  ;;  %v1537_v33 = vmul.f32 0.16666667, %v1473_v27  ;;  %v1222_v53 = vadd.f32 %v2575_v29, %v2472_v41  ;;  %v1254_v54 = vadd.f32 %v2577_v30, %v2472_v41 }
 0x18d   : > { %1600 = vst [vmem:[%s2485_s10 + $0x80] sm:$0xff] %v1536_v18  ;;  %1632 = vst [vmem:[%s2485_s10 + $0x180] sm:$0xff] %v1568_v10  ;;  %v1569_v59 = vmul.f32 0.16666667, %v1505_v19  ;;  %v1220_v25 = vadd.f32 %v2472_v41, %v2579_v37  ;;  %v1252_v28 = vadd.f32 %v2472_v41, %v2581_v38  ;;  %v1223_v60 = vadd.f32 %v2583_v48, %v2472_v41 }
 0x18e   : > { %1603 = vst [vmem:[%s2485_s10 + $0x98] sm:$0xff] %v1539_v13  ;;  %1635 = vst [vmem:[%s2485_s10 + $0x198] sm:$0xff] %v1571_v24  ;;  %v1286_v31 = vadd.f32 3.0, %v1222_v53  ;;  %v1318_v34 = vadd.f32 3.0, %v1254_v54  ;;  %v1255_v35 = vadd.f32 %v2585_v49, %v2472_v41  ;;  %v1221_v30 = vadd.f32 %v2472_v41, %v2589_v58 }
 0x18f   : > { %1601 = vst [vmem:[%s2485_s10 + $0x88] sm:$0xff] %v1537_v33  ;;  %1633 = vst [vmem:[%s2485_s10 + $0x188] sm:$0xff] %v1569_v59  ;;  %v1284_v29 = vadd.f32 3.0, %v1220_v25  ;;  %v1316_v36 = vadd.f32 3.0, %v1252_v28  ;;  %v1253_v39 = vadd.f32 %v2472_v41, %v2591_v42  ;;  %v1287_v63 = vadd.f32 3.0, %v1223_v60 }
 0x190   : > { %v1350_v37 = vmax.f32 %v1286_v31, 0.0  ;;  %v1382_v40 = vmax.f32 %v1318_v34, 0.0  ;;  %v1319_v38 = vadd.f32 3.0, %v1255_v35  ;;  %v1285_v0 = vadd.f32 3.0, %v1221_v30 }
 0x191   : > { %v1348_v44 = vmax.f32 %v1284_v29, 0.0  ;;  %v1380_v45 = vmax.f32 %v1316_v36, 0.0  ;;  %v1317_v52 = vadd.f32 3.0, %v1253_v39  ;;  %v1351_v43 = vmax.f32 %v1287_v63, 0.0 }
 0x192   : > { %v1414_v48 = vmin.f32 %v1350_v37, 6.0  ;;  %v1446_v55 = vmin.f32 %v1382_v40, 6.0  ;;  %v1383_v49 = vmax.f32 %v1319_v38, 0.0  ;;  %v1349_v1 = vmax.f32 %v1285_v0, 0.0 }
 0x193   : > { %v1412_v46 = vmin.f32 %v1348_v44, 6.0  ;;  %v1444_v3 = vmin.f32 %v1380_v45, 6.0  ;;  %v1381_v4 = vmax.f32 %v1317_v52, 0.0  ;;  %v1415_v42 = vmin.f32 %v1351_v43, 6.0 }
 0x194   : > { %v1478_v58 = vmul.f32 %v1414_v48, %v1222_v53  ;;  %v1510_v2 = vmul.f32 %v1446_v55, %v1254_v54  ;;  %v1447_v14 = vmin.f32 %v1383_v49, 6.0  ;;  %v1413_v62 = vmin.f32 %v1349_v1, 6.0 }
 0x195   : > { %v1476_v6 = vmul.f32 %v1412_v46, %v1220_v25  ;;  %v1508_v61 = vmul.f32 %v1444_v3, %v1252_v28  ;;  %v1445_v50 = vmin.f32 %v1381_v4, 6.0  ;;  %v1479_v17 = vmul.f32 %v1415_v42, %v1223_v60 }
 0x196   : > { %v1542_v5 = vmul.f32 0.16666667, %v1478_v58  ;;  %v1574_v15 = vmul.f32 0.16666667, %v1510_v2  ;;  %v1511_v18 = vmul.f32 %v1447_v14, %v1255_v35  ;;  %v1477_v19 = vmul.f32 %v1413_v62, %v1221_v30 }
 0x197   : > { %v1540_v10 = vmul.f32 0.16666667, %v1476_v6  ;;  %v1572_v27 = vmul.f32 0.16666667, %v1508_v61  ;;  %v1509_v13 = vmul.f32 %v1445_v50, %v1253_v39  ;;  %v1543_v24 = vmul.f32 0.16666667, %v1479_v17 }
 0x198   : > { %1606 = vst [vmem:[%s2485_s10 + $0xb0] sm:$0xff] %v1542_v5  ;;  %1638 = vst [vmem:[%s2485_s10 + $0x1b0] sm:$0xff] %v1574_v15  ;;  %v1575_v33 = vmul.f32 0.16666667, %v1511_v18  ;;  %v1541_v59 = vmul.f32 0.16666667, %v1477_v19  ;;  %v1226_v54 = vadd.f32 %v2615_v20, %v2472_v41  ;;  %v1258_v25 = vadd.f32 %v2617_v8, %v2472_v41 }
 0x199   : > { %1604 = vst [vmem:[%s2485_s10 + $0xa0] sm:$0xff] %v1540_v10  ;;  %1636 = vst [vmem:[%s2485_s10 + $0x1a0] sm:$0xff] %v1572_v27  ;;  %v1573_v53 = vmul.f32 0.16666667, %v1509_v13  ;;  %v1224_v28 = vadd.f32 %v2472_v41, %v2619_v26  ;;  %v1256_v31 = vadd.f32 %v2472_v41, %v2621_v57  ;;  %v1227_v35 = vadd.f32 %v2623_v32, %v2472_v41  ;;  %v2092_v10 = vld [vmem:[%s2803_s2] ss:$0 sm:$0xff] }
 0x19a   : > { %1607 = vst [vmem:[%s2485_s10 + $0xb8] sm:$0xff] %v1543_v24  ;;  %1639 = vst [vmem:[%s2485_s10 + $0x1b8] sm:$0xff] %v1575_v33  ;;  %v1290_v34 = vadd.f32 3.0, %v1226_v54  ;;  %v1322_v60 = vadd.f32 3.0, %v1258_v25  ;;  %v1259_v29 = vadd.f32 %v2625_v16, %v2472_v41  ;;  %v1225_v8 = vadd.f32 %v2472_v41, %v2627_v22 }
 0x19b   : > { %1605 = vst [vmem:[%s2485_s10 + $0xa8] sm:$0xff] %v1541_v59  ;;  %1637 = vst [vmem:[%s2485_s10 + $0x1a8] sm:$0xff] %v1573_v53  ;;  %v1288_v20 = vadd.f32 3.0, %v1224_v28  ;;  %v1320_v36 = vadd.f32 3.0, %v1256_v31  ;;  %v1257_v30 = vadd.f32 %v2472_v41, %v2629_v23  ;;  %v1291_v37 = vadd.f32 3.0, %v1227_v35 }
 0x19c   : > { %v1354_v26 = vmax.f32 %v1290_v34, 0.0  ;;  %v1386_v39 = vmax.f32 %v1322_v60, 0.0  ;;  %v1323_v57 = vadd.f32 3.0, %v1259_v29  ;;  %v1289_v38 = vadd.f32 3.0, %v1225_v8 }
 0x19d   : > { %v1352_v40 = vmax.f32 %v1288_v20, 0.0  ;;  %v1384_v63 = vmax.f32 %v1320_v36, 0.0  ;;  %v1321_v44 = vadd.f32 3.0, %v1257_v30  ;;  %v1355_v0 = vmax.f32 %v1291_v37, 0.0 }
 0x19e   : > { %v1418_v32 = vmin.f32 %v1354_v26, 6.0  ;;  %v1450_v45 = vmin.f32 %v1386_v39, 6.0  ;;  %v1387_v16 = vmax.f32 %v1323_v57, 0.0  ;;  %v1353_v55 = vmax.f32 %v1289_v38, 0.0 }
 0x19f   : > { %v1416_v52 = vmin.f32 %v1352_v40, 6.0  ;;  %v1448_v48 = vmin.f32 %v1384_v63, 6.0  ;;  %v1385_v43 = vmax.f32 %v1321_v44, 0.0  ;;  %v1419_v41 = vmin.f32 %v1355_v0, 6.0 }
 0x1a0   : > { %v1482_v22 = vmul.f32 %v1418_v32, %v1226_v54  ;;  %v1514_v49 = vmul.f32 %v1450_v45, %v1258_v25  ;;  %v1451_v23 = vmin.f32 %v1387_v16, 6.0  ;;  %v1417_v1 = vmin.f32 %v1353_v55, 6.0 }
 0x1a1   : > { %v1480_v46 = vmul.f32 %v1416_v52, %v1224_v28  ;;  %v1512_v3 = vmul.f32 %v1448_v48, %v1256_v31  ;;  %v1449_v4 = vmin.f32 %v1385_v43, 6.0  ;;  %v1483_v42 = vmul.f32 %v1419_v41, %v1227_v35 }
 0x1a2   : > { %v1546_v58 = vmul.f32 0.16666667, %v1482_v22  ;;  %v1578_v2 = vmul.f32 0.16666667, %v1514_v49  ;;  %v1515_v14 = vmul.f32 %v1451_v23, %v1259_v29  ;;  %v1481_v62 = vmul.f32 %v1417_v1, %v1225_v8 }
 0x1a3   : > { %v1544_v6 = vmul.f32 0.16666667, %v1480_v46  ;;  %v1576_v61 = vmul.f32 0.16666667, %v1512_v3  ;;  %v1513_v50 = vmul.f32 %v1449_v4, %v1257_v30  ;;  %v1547_v5 = vmul.f32 0.16666667, %v1483_v42 }
 0x1a4   : > { %1610 = vst [vmem:[%s2485_s10 + $0xd0] sm:$0xff] %v1546_v58  ;;  %1642 = vst [vmem:[%s2485_s10 + $0x1d0] sm:$0xff] %v1578_v2  ;;  %v1579_v15 = vmul.f32 0.16666667, %v1515_v14  ;;  %v1545_v17 = vmul.f32 0.16666667, %v1481_v62  ;;  %v1230_v27 = vadd.f32 %v2092_v10, %v2631_v47  ;;  %v1262_v19 = vadd.f32 %v2092_v10, %v2633_v21 }
 0x1a5   : > { %1608 = vst [vmem:[%s2485_s10 + $0xc0] sm:$0xff] %v1544_v6  ;;  %1640 = vst [vmem:[%s2485_s10 + $0x1c0] sm:$0xff] %v1576_v61  ;;  %v1577_v18 = vmul.f32 0.16666667, %v1513_v50  ;;  %v1228_v13 = vadd.f32 %v2092_v10, %v2637_v56  ;;  %v1260_v24 = vadd.f32 %v2092_v10, %v2639_v51  ;;  %v1231_v53 = vadd.f32 %v2092_v10, %v2643_v7 }
 0x1a6   : > { %1611 = vst [vmem:[%s2485_s10 + $0xd8] sm:$0xff] %v1547_v5  ;;  %1643 = vst [vmem:[%s2485_s10 + $0x1d8] sm:$0xff] %v1579_v15  ;;  %v1294_v33 = vadd.f32 3.0, %v1230_v27  ;;  %v1326_v59 = vadd.f32 3.0, %v1262_v19  ;;  %v1263_v54 = vadd.f32 %v2092_v10, %v2645_v9  ;;  %v1229_v31 = vadd.f32 %v2092_v10, %v2653_v11 }
 0x1a7   : > { %1609 = vst [vmem:[%s2485_s10 + $0xc8] sm:$0xff] %v1545_v17  ;;  %1641 = vst [vmem:[%s2485_s10 + $0x1c8] sm:$0xff] %v1577_v18  ;;  %v1292_v25 = vadd.f32 3.0, %v1228_v13  ;;  %v1324_v28 = vadd.f32 3.0, %v1260_v24  ;;  %v1261_v47 = vadd.f32 %v2092_v10, %v2655_v12  ;;  %v1295_v60 = vadd.f32 3.0, %v1231_v53 }
 0x1a8   : > { %v1358_v34 = vmax.f32 %v1294_v33, 0.0  ;;  %v1390_v21 = vmax.f32 %v1326_v59, 0.0  ;;  %v1327_v35 = vadd.f32 3.0, %v1263_v54  ;;  %v1293_v20 = vadd.f32 3.0, %v1229_v31 }
 0x1a9   : > { %v1356_v29 = vmax.f32 %v1292_v25, 0.0  ;;  %v1388_v56 = vmax.f32 %v1324_v28, 0.0  ;;  %v1325_v51 = vadd.f32 3.0, %v1261_v47  ;;  %v1359_v7 = vmax.f32 %v1295_v60, 0.0 }
 0x1aa   : > { %v1422_v36 = vmin.f32 %v1358_v34, 6.0  ;;  %v1454_v8 = vmin.f32 %v1390_v21, 6.0  ;;  %v1391_v9 = vmax.f32 %v1327_v35, 0.0  ;;  %v1357_v39 = vmax.f32 %v1293_v20, 0.0 }
 0x1ab   : > { %v1420_v30 = vmin.f32 %v1356_v29, 6.0  ;;  %v1452_v26 = vmin.f32 %v1388_v56, 6.0  ;;  %v1389_v11 = vmax.f32 %v1325_v51, 0.0  ;;  %v1423_v57 = vmin.f32 %v1359_v7, 6.0 }
 0x1ac   : > { %v1486_v37 = vmul.f32 %v1422_v36, %v1230_v27  ;;  %v1518_v12 = vmul.f32 %v1454_v8, %v1262_v19  ;;  %v1455_v40 = vmin.f32 %v1391_v9, 6.0  ;;  %v1421_v44 = vmin.f32 %v1357_v39, 6.0 }
 0x1ad   : > { %v1484_v63 = vmul.f32 %v1420_v30, %v1228_v13  ;;  %v1516_v38 = vmul.f32 %v1452_v26, %v1260_v24  ;;  %v1453_v32 = vmin.f32 %v1389_v11, 6.0  ;;  %v1487_v16 = vmul.f32 %v1423_v57, %v1231_v53 }
 0x1ae   : > { %v1550_v45 = vmul.f32 0.16666667, %v1486_v37  ;;  %v1582_v0 = vmul.f32 0.16666667, %v1518_v12  ;;  %v1519_v52 = vmul.f32 %v1455_v40, %v1263_v54  ;;  %v1485_v43 = vmul.f32 %v1421_v44, %v1229_v31 }
 0x1af   : > { %v1548_v48 = vmul.f32 0.16666667, %v1484_v63  ;;  %v1580_v55 = vmul.f32 0.16666667, %v1516_v38  ;;  %v1517_v22 = vmul.f32 %v1453_v32, %v1261_v47  ;;  %v1551_v49 = vmul.f32 0.16666667, %v1487_v16 }
 0x1b0   : > { %1614 = vst [vmem:[%s2485_s10 + $0xf0] sm:$0xff] %v1550_v45  ;;  %1646 = vst [vmem:[%s2485_s10 + $0x1f0] sm:$0xff] %v1582_v0  ;;  %v1583_v41 = vmul.f32 0.16666667, %v1519_v52  ;;  %v1549_v23 = vmul.f32 0.16666667, %v1485_v43 }
 0x1b1   : > { %1612 = vst [vmem:[%s2485_s10 + $0xe0] sm:$0xff] %v1548_v48  ;;  %1644 = vst [vmem:[%s2485_s10 + $0x1e0] sm:$0xff] %v1580_v55  ;;  %v1581_v46 = vmul.f32 0.16666667, %v1517_v22 }
 0x1b2   : > { %1615 = vst [vmem:[%s2485_s10 + $0xf8] sm:$0xff] %v1551_v49  ;;  %1647 = vst [vmem:[%s2485_s10 + $0x1f8] sm:$0xff] %v1583_v41 }
 0x1b3   : > { %1613 = vst [vmem:[%s2485_s10 + $0xe8] sm:$0xff] %v1549_v23  ;;  %1645 = vst [vmem:[%s2485_s10 + $0x1e8] sm:$0xff] %v1581_v46 }
 0x1b4   : > { %2164 = shalt.err (!%p2161_p5)
}
 0x1b5   : > { %s2165_s8 = scalar_lea.hbm %s2745_s26, 8192  ;;  %s2169_s24 = scalar_lea.hbm %s2804_s3, 32768 }
 0x1b6   : > { %p2166_p9 = scmp.ne.s32.totalorder %s2745_s26, %s2165_s8  ;;  %p2170_p3 = scmp.lt.u32.totalorder %s2745_s26, %s2804_s3 }
 0x1b7   : > { %p2171_p7 = scmp.lt.u32.totalorder %s2169_s24, %s2165_s8  ;;  %p2173_p4 = scmp.lt.u32.totalorder %s2165_s8, %s2745_s26 }
 0x1b8   : > { %p2167_p1 = pnand %p2166_p9, %p2364_p11 }
 0x1b9   : > { %p2172_p13 = por %p2171_p7, %p2170_p3 }
 0x1ba   : > { %p2168_p2 = pneg %p2167_p1 }
 0x1bb   : > { %p2174_p6 = por %p2173_p4, %p2172_p13 }
 0x1bd   : > { %p2175_p8 = pnand %p2174_p6, %p2168_p2 }
 0x1bf   : > { %2178 = shalt.err (!%p2175_p8)
}
 0x1c0   : > { %s2244_s9 = smov 128   ;;  %s2245_s18 = smov 8  }
 0x1c1   : > { %1980 = dma.vmem_to_hbm [thread:$0]  (%p2364_p11), %s2747_s19, 8192, %s2745_s26, %s1649_s21, %s2244_s9, %s2244_s9, %s2245_s18  }
 0x1c2 PF: > { %p1997_p12 = scmp.ge.s32.totalorder %s2237_s17, 2  ;;  %s1678_s15 = sand.u32 1, %s2217_s12  }
 0x1c3   : > { %p2822_p10 = scmp.ne.s32.totalorder %s2812_s23, 0  ;;  %s1679_s25 = scalar_lea.sflag [#allocation4], %s1678_s15 }
 0x1c5   : > { %p1991_p0 = pnand %p1997_p12, %p2822_p10 }
 0x1c7   : > { %2212 = dma.done.wait (!%p1991_p0), %s1679_s25, 8192  }
 0x1c8   : > { %2214 = vsyncadd (!%p1991_p0), %s1679_s25, 4294959104  ;;  %s20_s17 = sadd.s32 1, %s2237_s17   ;;  %s2823_s12 = smov %s2221_s13 }
 0x1c9   : > { %p17_p5 = scmp.ge.s32.totalorder %s20_s17, 6   ;;  %s2824_s13 = smov %s2225_s14 }
 0x1ca   : > { %s2825_s14 = smov %s2373_s5  ;;  %s2826_s15 = smov %s2233_s16 }
 0x1cb   : > { %s2827_s16 = smov %s2829_s28  ;;  %19 = sbr.rel (!%p17_p5) target bundleno = 7 (0x7), region = 93 }
 0x1d2   :  { %1684 = vsyncpa [#allocation3], 1 }
 0x1d3   :  { %1686 = vsyncpa [#allocation3 + $0x1], 1 }
 0x1d4   :  { %1687 = vsyncpa [#allocation6], 1 }
 0x1d5   :  { %1688 = vsyncpa [#allocation4], 1 }
 0x1d6   :  { %1690 = vsyncpa [#allocation4 + $0x1], 1 }

</bundles_post_ra>
